<compile_context>
chip_gen: v7x
topology: tpu7x:2x2x1
jax: 0.10.0
libtpu: 0.0.40
codegen_flags: <defaults>
</compile_context>

<pallas_src>
import functools
import math

import jax
import jax.numpy as jnp
import numpy as np
from jax.experimental import pallas as pl
from jax.experimental.pallas import tpu as pltpu

HIDDEN = 256                      # real Baichuan2-13B: 5120
NUM_HEADS = 2                     # real: 40
HEAD_DIM = HIDDEN // NUM_HEADS    # 128 (same as the real model)
INTER = 512                       # real: 13696
RMS_EPS = 1e-6


# --------------------------- tile helpers -----------------------------------

def _seq_tile(s):
    for t in (256, 128, 8):
        if s % t == 0:
            return t
    return s


def _n_tile(n):
    for t in (256, 128):
        if n % t == 0:
            return t
    return n


def _k_tile(k):
    if k > 512 and k % 512 == 0:
        return 512
    if k > 128 and k % 128 == 0:
        return 128
    return k


def _kv_tile(t):
    if t > 512 and t % 512 == 0:
        return 512
    if t > 128 and t % 128 == 0:
        return 128
    if t > 8 and t % 8 == 0:
        return 8
    return t


def _i_tile(i):
    for t in (256, 128):
        if i % t == 0:
            return t
    return i


# --------------------------- fused RMSNorm + matmul --------------------------

def _rms_matmul_kernel(x_ref, g_ref, w_ref, o_ref, acc_ref, rstd_ref, *, tk, eps):
    kidx = pl.program_id(2)

    @pl.when(kidx == 0)
    def _():
        acc_ref[...] = jnp.zeros_like(acc_ref)
        xf = x_ref[...].astype(jnp.float32)
        rstd_ref[...] = jax.lax.rsqrt(
            jnp.mean(xf * xf, axis=-1, keepdims=True) + eps)

    off = pl.multiple_of(kidx * tk, tk)
    xc = x_ref[:, pl.ds(off, tk)].astype(jnp.float32)
    gc = g_ref[:, pl.ds(off, tk)].astype(jnp.float32)
    xn = (xc * rstd_ref[...] * gc).astype(w_ref.dtype)          # bf16 at MXU input
    acc_ref[...] += jnp.dot(xn, w_ref[...], preferred_element_type=jnp.float32)

    @pl.when(kidx == pl.num_programs(2) - 1)
    def _():
        o_ref[...] = acc_ref[...].astype(o_ref.dtype)


def rms_matmul(x, gamma, w, *, tm, tn, tk):
    """out = rmsnorm(x, gamma) @ w  (bf16 out, f32 accumulate)."""
    S, K = x.shape
    N = w.shape[1]
    assert S % tm == 0 and N % tn == 0 and K % tk == 0
    kernel = functools.partial(_rms_matmul_kernel, tk=tk, eps=RMS_EPS)
    return pl.pallas_call(
        kernel,
        out_shape=jax.ShapeDtypeStruct((S, N), jnp.bfloat16),
        grid_spec=pltpu.PrefetchScalarGridSpec(
            num_scalar_prefetch=0,
            grid=(S // tm, N // tn, K // tk),
            in_specs=[
                pl.BlockSpec((tm, K), lambda i, j, k: (i, 0)),    # full-K x tile
                pl.BlockSpec((1, K), lambda i, j, k: (0, 0)),     # rmsnorm gamma
                pl.BlockSpec((tk, tn), lambda i, j, k: (k, j)),   # weight tile
            ],
            out_specs=pl.BlockSpec((tm, tn), lambda i, j, k: (i, j)),
            scratch_shapes=[pltpu.VMEM((tm, tn), jnp.float32),
                            pltpu.VMEM((tm, 1), jnp.float32)]),
        compiler_params=pltpu.CompilerParams(
            dimension_semantics=("parallel", "parallel", "arbitrary")),
    )(x, gamma.reshape(1, K).astype(jnp.float32), w)


# --------------------------- matmul + residual -------------------------------

def _matmul_residual_kernel(x_ref, w_ref, r_ref, o_ref, acc_ref):
    k = pl.program_id(2)

    @pl.when(k == 0)
    def _():
        acc_ref[...] = jnp.zeros_like(acc_ref)

    acc_ref[...] += jnp.dot(x_ref[...], w_ref[...],
                            preferred_element_type=jnp.float32)

    @pl.when(k == pl.num_programs(2) - 1)
    def _():
        o_ref[...] = (r_ref[...].astype(jnp.float32) +
                      acc_ref[...]).astype(o_ref.dtype)


def matmul_residual(x, w, res, *, tm, tn, tk):
    """out = res + x @ w  (residual add fused in the epilogue)."""
    S, K = x.shape
    N = w.shape[1]
    assert res.shape == (S, N)
    assert S % tm == 0 and N % tn == 0 and K % tk == 0
    return pl.pallas_call(
        _matmul_residual_kernel,
        out_shape=jax.ShapeDtypeStruct((S, N), jnp.bfloat16),
        grid_spec=pltpu.PrefetchScalarGridSpec(
            num_scalar_prefetch=0,
            grid=(S // tm, N // tn, K // tk),
            in_specs=[
                pl.BlockSpec((tm, tk), lambda i, j, k: (i, k)),
                pl.BlockSpec((tk, tn), lambda i, j, k: (k, j)),
                pl.BlockSpec((tm, tn), lambda i, j, k: (i, j)),
            ],
            out_specs=pl.BlockSpec((tm, tn), lambda i, j, k: (i, j)),
            scratch_shapes=[pltpu.VMEM((tm, tn), jnp.float32)]),
        compiler_params=pltpu.CompilerParams(
            dimension_semantics=("parallel", "parallel", "arbitrary")),
    )(x, w, res)


# --------------------------- in-place KV cache update ------------------------

def _kv_update_kernel(qkv_ref, cache_hbm_ref, out_ref):
    del cache_hbm_ref   # aliased to out; untouched regions keep their contents
    out_ref[0, 0, 0] = qkv_ref[...]


def kv_cache_update(qkv, cache, *, past_len):
    """Write the new k/v rows (taken straight from the packed qkv buffer) into the
    preallocated cache at offset past_len; the cache is aliased to the output."""
    S = qkv.shape[0]
    _, _, nh, t_max, D = cache.shape
    assert past_len + S <= t_max
    # TODO(synk): support write offsets that are not a multiple of q_len
    # (misaligned chunked prefill) via manual DMA / pl.Element offsets.
    assert past_len % S == 0
    return pl.pallas_call(
        _kv_update_kernel,
        out_shape=jax.ShapeDtypeStruct(cache.shape, cache.dtype),
        grid=(2, nh),                                     # (k-or-v, head)
        in_specs=[
            pl.BlockSpec((S, D), lambda c, h: (0, (c + 1) * nh + h)),
            pl.BlockSpec(memory_space=pl.ANY),            # aliased cache, no DMA
        ],
        out_specs=pl.BlockSpec((1, 1, 1, S, D),
                               lambda c, h: (c, 0, h, past_len // S, 0)),
        input_output_aliases={1: 0},
        compiler_params=pltpu.CompilerParams(
            dimension_semantics=("arbitrary", "arbitrary")),
    )(qkv, cache)


# --------------------------- flash attention (ALiBi in-kernel) ---------------

def _attn_kernel(q_ref, slope_ref, kv_ref, o_ref, m_ref, l_ref, acc_ref, *,
                 scale, past_len, tq, tkv):
    qi = pl.program_id(1)
    ki = pl.program_id(2)

    @pl.when(ki == 0)
    def _():
        m_ref[...] = jnp.full(m_ref.shape, -1e30, jnp.float32)
        l_ref[...] = jnp.zeros_like(l_ref)
        acc_ref[...] = jnp.zeros_like(acc_ref)

    # Causal tile skip: if the first key position of this KV tile is already
    # past the last query position of this q tile, the whole tile is masked.
    # (The ki == 0 tile is never skipped, so l > 0 is guaranteed at finalize.)
    first_k = ki * tkv
    last_q = past_len + (qi + 1) * tq - 1

    @pl.when(first_k <= last_q)
    def _():
        q = q_ref[...]                 # (G, tq, D)  bf16
        k = kv_ref[0, 0]               # (G, tkv, D) bf16
        v = kv_ref[1, 0]               # (G, tkv, D) bf16
        s = jnp.einsum("gqd,gkd->gqk", q, k,
                       preferred_element_type=jnp.float32) * scale

        iq = jax.lax.broadcasted_iota(jnp.int32, (tq, tkv), 0)
        ik = jax.lax.broadcasted_iota(jnp.int32, (tq, tkv), 1)
        qpos = past_len + qi * tq + iq
        kpos = ki * tkv + ik
        slope = slope_ref[...].astype(jnp.float32)                 # (G, 1)
        alibi = -slope[:, :, None] * (qpos - kpos).astype(jnp.float32)[None]
        bias = jnp.where((kpos <= qpos)[None], alibi, -1e9)        # causal + ALiBi
        s = s + bias

        m_prev = m_ref[...]
        m_new = jnp.maximum(m_prev, jnp.max(s, axis=-1, keepdims=True))
        alpha = jnp.exp(m_prev - m_new)
        p = jnp.exp(s - m_new)
        l_ref[...] = alpha * l_ref[...] + jnp.sum(p, axis=-1, keepdims=True)
        acc_ref[...] = alpha * acc_ref[...] + jnp.einsum(
            "gqk,gkd->gqd", p.astype(v.dtype), v,
            preferred_element_type=jnp.float32)
        m_ref[...] = m_new

    @pl.when(ki == pl.num_programs(2) - 1)
    def _():
        o_ref[...] = (acc_ref[...] *
                      pl.reciprocal(l_ref[...], approx=True)).astype(o_ref.dtype)


def attention(qh, kv_cache, slopes, *, past_len, G, tq, tkv):
    """qh: (nh, S, D); kv_cache: (2, 1, nh, T, D).  Cache entries past
    past_len+S are harmless: they are causally masked / their tiles skipped.
    Returns (nh, S, D) bf16."""
    nh, S, D = qh.shape
    T = kv_cache.shape[3]
    assert nh % G == 0 and S % tq == 0 and T % tkv == 0
    kernel = functools.partial(_attn_kernel, scale=1.0 / math.sqrt(D),
                               past_len=past_len, tq=tq, tkv=tkv)
    return pl.pallas_call(
        kernel,
        out_shape=jax.ShapeDtypeStruct((nh, S, D), jnp.bfloat16),
        grid_spec=pltpu.PrefetchScalarGridSpec(
            num_scalar_prefetch=0,
            grid=(nh // G, S // tq, T // tkv),
            in_specs=[
                pl.BlockSpec((G, tq, D), lambda g, qi, ki: (g, qi, 0)),
                pl.BlockSpec((G, 1), lambda g, qi, ki: (g, 0)),
                pl.BlockSpec((2, 1, G, tkv, D),
                             lambda g, qi, ki: (0, 0, g, ki, 0)),
            ],
            out_specs=pl.BlockSpec((G, tq, D), lambda g, qi, ki: (g, qi, 0)),
            scratch_shapes=[pltpu.VMEM((G, tq, 1), jnp.float32),   # m
                            pltpu.VMEM((G, tq, 1), jnp.float32),   # l
                            pltpu.VMEM((G, tq, D), jnp.float32)]), # acc
        compiler_params=pltpu.CompilerParams(
            dimension_semantics=("parallel", "parallel", "arbitrary")),
    )(qh, slopes.reshape(nh, 1).astype(jnp.float32), kv_cache)


# --------------------------- fused RMSNorm + SwiGLU MLP ----------------------

def _rms_mlp_kernel(x_ref, g_ref, wg_ref, wu_ref, wd_ref, r_ref, o_ref,
                    acc_ref, xn_ref, *, eps):
    i = pl.program_id(1)

    @pl.when(i == 0)
    def _():
        acc_ref[...] = jnp.zeros_like(acc_ref)
        xf = x_ref[...].astype(jnp.float32)
        rstd = jax.lax.rsqrt(jnp.mean(xf * xf, axis=-1, keepdims=True) + eps)
        xn_ref[...] = (xf * rstd * g_ref[...].astype(jnp.float32)).astype(xn_ref.dtype)

    xn = xn_ref[...]
    gt = jnp.dot(xn, wg_ref[...], preferred_element_type=jnp.float32)
    ut = jnp.dot(xn, wu_ref[...], preferred_element_type=jnp.float32)
    h = (gt * jax.nn.sigmoid(gt)) * ut          # SiLU(gate) * up, f32 elementwise
    acc_ref[...] += jnp.dot(h.astype(wd_ref.dtype), wd_ref[...],
                            preferred_element_type=jnp.float32)

    @pl.when(i == pl.num_programs(1) - 1)
    def _():
        o_ref[...] = (r_ref[...].astype(jnp.float32) +
                      acc_ref[...]).astype(o_ref.dtype)


def rms_mlp(x, gamma, wg, wu, wd, res, *, tm, ti):
    """out = res + SwiGLU(rmsnorm(x, gamma)) @ wd, tiled over S and intermediate."""
    S, H = x.shape
    I = wg.shape[1]
    assert S % tm == 0 and I % ti == 0
    kernel = functools.partial(_rms_mlp_kernel, eps=RMS_EPS)
    return pl.pallas_call(
        kernel,
        out_shape=jax.ShapeDtypeStruct((S, H), jnp.bfloat16),
        grid_spec=pltpu.PrefetchScalarGridSpec(
            num_scalar_prefetch=0,
            grid=(S // tm, I // ti),
            in_specs=[
                pl.BlockSpec((tm, H), lambda s, i: (s, 0)),
                pl.BlockSpec((1, H), lambda s, i: (0, 0)),
                pl.BlockSpec((H, ti), lambda s, i: (0, i)),
                pl.BlockSpec((H, ti), lambda s, i: (0, i)),
                pl.BlockSpec((ti, H), lambda s, i: (i, 0)),
                pl.BlockSpec((tm, H), lambda s, i: (s, 0)),
            ],
            out_specs=pl.BlockSpec((tm, H), lambda s, i: (s, 0)),
            scratch_shapes=[pltpu.VMEM((tm, H), jnp.float32),
                            pltpu.VMEM((tm, H), jnp.bfloat16)]),
        compiler_params=pltpu.CompilerParams(
            dimension_semantics=("parallel", "arbitrary")),
    )(x, gamma.reshape(1, H).astype(jnp.float32), wg, wu, wd, res)


# --------------------------- standalone RMSNorm (final model norm) -----------

def _rmsnorm_kernel(x_ref, g_ref, o_ref, *, eps):
    xf = x_ref[...].astype(jnp.float32)
    rstd = jax.lax.rsqrt(jnp.mean(xf * xf, axis=-1, keepdims=True) + eps)
    o_ref[...] = (xf * rstd * g_ref[...].astype(jnp.float32)).astype(o_ref.dtype)


def rmsnorm(x, gamma, *, tm):
    S, H = x.shape
    assert S % tm == 0
    kernel = functools.partial(_rmsnorm_kernel, eps=RMS_EPS)
    return pl.pallas_call(
        kernel,
        out_shape=jax.ShapeDtypeStruct((S, H), jnp.bfloat16),
        grid=(S // tm,),
        in_specs=[pl.BlockSpec((tm, H), lambda i: (i, 0)),
                  pl.BlockSpec((1, H), lambda i: (0, 0))],
        out_specs=pl.BlockSpec((tm, H), lambda i: (i, 0)),
        compiler_params=pltpu.CompilerParams(dimension_semantics=("parallel",)),
    )(x, gamma.reshape(1, H).astype(jnp.float32))


# --------------------------- block forward ----------------------------------

def baichuan2_block_forward(params, hidden_states, attention_mask, position_ids,
                            past_kv, *, past_len, final_layernorm=False):
    # position_ids unused (ALiBi, not RoPE) -- matches the PyTorch block.
    # attention_mask (additive ALiBi + causal) is what Baichuan2 passes per layer;
    # we rebuild the identical bias inside the attention kernel from the per-head
    # slopes + positions instead of streaming the (1, nh, S, T) tensor from HBM.
    del attention_mask, position_ids
    H = HIDDEN
    x = hidden_states.reshape(1, -1, H).astype(jnp.bfloat16)    # .view(1, -1, 5120)
    q_len = x.shape[1]
    x2 = x[0]                                                   # (S, H) bf16

    tm = _seq_tile(q_len)
    tk = _k_tile(H)

    # --- self attention ---
    # input_layernorm fused into the W_pack projection (single pass over x).
    qkv = rms_matmul(x2, params["ln1_w"], params["w_pack"],
                     tm=tm, tn=_n_tile(3 * H), tk=tk)           # (S, 3H) bf16

    # In-place aliased KV-cache write; k/v read straight from the packed qkv
    # buffer by the BlockSpec index_map (no XLA head split / transpose).
    presents = kv_cache_update(qkv, past_kv, past_len=past_len)

    q = qkv[:, :H]
    qh = q.reshape(q_len, NUM_HEADS, HEAD_DIM).transpose(1, 0, 2)   # (nh, S, D)

    T = presents.shape[3]
    G = 8 if NUM_HEADS % 8 == 0 else NUM_HEADS
    attn = attention(qh, presents, params["alibi_slopes"],
                     past_len=past_len, G=G, tq=tm, tkv=_kv_tile(T))
    attn_out = attn.transpose(1, 0, 2).reshape(q_len, H)

    # o_proj with the residual add fused into the epilogue.
    h = matmul_residual(attn_out, params["w_o"], x2,
                        tm=tm, tn=_n_tile(H), tk=tk)

    # --- MLP: post_attention_layernorm + SwiGLU + down_proj + residual, fused ---
    h = rms_mlp(h, params["ln2_w"], params["w_gate"], params["w_up"],
                params["w_down"], h, tm=tm, ti=_i_tile(INTER))

    out = h.reshape(1, q_len, H)
    if final_layernorm:
        # model.norm + keep last token (RMSNorm is row-wise, so norm-then-slice
        # == slice-then-norm; slicing first avoids normalizing S-1 unused rows).
        out = rmsnorm(h[-1:], params["final_ln_w"], tm=1).reshape(1, 1, H)
    return out, presents


# --------------------------- pure-JAX reference ------------------------------

def _ref_rmsnorm(x, w):
    var = jnp.mean(x.astype(jnp.float32) ** 2, axis=-1, keepdims=True)
    return w * (x * jax.lax.rsqrt(var + RMS_EPS))


def reference_forward(params, hidden_states, attention_mask, position_ids,
                      past_kv, *, past_len, final_layernorm=False):
    del position_ids
    f32 = jnp.float32
    H = HIDDEN
    x = hidden_states.reshape(1, -1, H)[0].astype(f32)
    q_len = x.shape[0]
    w_pack = params["w_pack"].astype(f32)
    w_o = params["w_o"].astype(f32)
    w_gate = params["w_gate"].astype(f32)
    w_up = params["w_up"].astype(f32)
    w_down = params["w_down"].astype(f32)

    residual = x
    xn = _ref_rmsnorm(x, params["ln1_w"].astype(f32))
    qkv = xn @ w_pack
    q, k, v = qkv[:, :H], qkv[:, H:2 * H], qkv[:, 2 * H:]
    to_heads = lambda t: t.reshape(q_len, NUM_HEADS, HEAD_DIM).transpose(1, 0, 2)
    qh, kh, vh = to_heads(q), to_heads(k), to_heads(v)
    past_k = past_kv[0, 0, :, :past_len].astype(f32)
    past_v = past_kv[1, 0, :, :past_len].astype(f32)
    k_full = jnp.concatenate([past_k, kh], axis=1)
    v_full = jnp.concatenate([past_v, vh], axis=1)
    presents = jnp.stack([k_full[None], v_full[None]])
    T = k_full.shape[1]
    mask = attention_mask
    if q_len == 1:
        mask = mask[:, :, -1:, :] if mask.ndim == 4 else mask[:, -1:, :]
    mask3 = jnp.broadcast_to(mask, (1, NUM_HEADS, q_len, T))[0]
    scores = jnp.einsum("hqd,hkd->hqk", qh, k_full) / math.sqrt(HEAD_DIM)
    scores = jnp.maximum(scores + mask3, jnp.finfo(f32).min)
    p = jax.nn.softmax(scores, axis=-1)
    attn = jnp.einsum("hqk,hkd->hqd", p, v_full).transpose(1, 0, 2).reshape(q_len, H)
    h = residual + attn @ w_o
    residual = h
    hn = _ref_rmsnorm(h, params["ln2_w"].astype(f32))
    g = hn @ w_gate
    h = residual + ((g * jax.nn.sigmoid(g)) * (hn @ w_up)) @ w_down
    out = h.reshape(1, q_len, H)
    if final_layernorm:
        out = _ref_rmsnorm(out[0], params["final_ln_w"].astype(f32)).reshape(1, q_len, H)
        out = out.reshape(-1, H)[-1].reshape(1, 1, H)
    return out, presents


# --------------------------- main --------------------------------------------

if __name__ == "__main__":
    SEQ, PAST = 8, 8
    T_VALID = SEQ + PAST
    T_CACHE = 32                 # preallocated cache capacity > past+new,
                                 # exercises the causal KV-tile skip path.
    key = jax.random.PRNGKey(0)
    ks = jax.random.split(key, 12)
    s = 0.02

    params = {
        "ln1_w":      1.0 + 0.1 * jax.random.normal(ks[0], (HIDDEN,), jnp.float32),
        "ln2_w":      1.0 + 0.1 * jax.random.normal(ks[1], (HIDDEN,), jnp.float32),
        "final_ln_w": 1.0 + 0.1 * jax.random.normal(ks[2], (HIDDEN,), jnp.float32),
        "w_pack": (s * jax.random.normal(ks[3], (HIDDEN, 3 * HIDDEN), jnp.float32)).astype(jnp.bfloat16),
        "w_o":    (s * jax.random.normal(ks[4], (HIDDEN, HIDDEN), jnp.float32)).astype(jnp.bfloat16),
        "w_gate": (s * jax.random.normal(ks[5], (HIDDEN, INTER), jnp.float32)).astype(jnp.bfloat16),
        "w_up":   (s * jax.random.normal(ks[6], (HIDDEN, INTER), jnp.float32)).astype(jnp.bfloat16),
        "w_down": (s * jax.random.normal(ks[7], (INTER, HIDDEN), jnp.float32)).astype(jnp.bfloat16),
        "alibi_slopes": 2.0 ** (-8.0 * (jnp.arange(NUM_HEADS, dtype=jnp.float32) + 1)
                                / NUM_HEADS),
    }

    hidden_states = jax.random.normal(ks[8], (SEQ, HIDDEN), jnp.float32)
    past_kv = (0.1 * jax.random.normal(ks[9], (2, 1, NUM_HEADS, PAST, HEAD_DIM),
                                       jnp.float32)).astype(jnp.bfloat16)
    position_ids = jnp.arange(PAST, PAST + SEQ, dtype=jnp.int32)[None]

    # Materialized additive ALiBi + causal mask, used only by the f32 reference;
    # the Pallas attention kernel regenerates the identical bias in-kernel.
    slopes = params["alibi_slopes"]
    qpos = PAST + jnp.arange(SEQ, dtype=jnp.float32)[:, None]
    kpos = jnp.arange(T_VALID, dtype=jnp.float32)[None, :]
    alibi = -slopes[:, None, None] * (qpos - kpos)[None]
    causal = (kpos <= qpos)[None]
    attention_mask = jnp.where(causal, alibi, -1e9)[None]        # (1, nh, S, T)

    fwd = jax.jit(baichuan2_block_forward,
                  static_argnames=("past_len", "final_layernorm"),
                  donate_argnames=("past_kv",))

    for use_final_ln in (False, True):
        ref_out, ref_presents = reference_forward(
            params, hidden_states, attention_mask, position_ids, past_kv,
            past_len=PAST, final_layernorm=use_final_ln)

        # Preallocated cache (past entries + room for the new tokens + spare
        # tail); donated to the jit so the Pallas aliased write is truly in place.
        cache = jnp.concatenate(
            [past_kv, jnp.zeros((2, 1, NUM_HEADS, T_CACHE - PAST, HEAD_DIM),
                                jnp.bfloat16)],
            axis=3)
        out, presents = fwd(params, hidden_states, attention_mask, position_ids,
                            cache, past_len=PAST, final_layernorm=use_final_ln)
        out = jax.block_until_ready(out)
        presents = jax.block_until_ready(presents)

        np.testing.assert_allclose(np.asarray(out.astype(jnp.float32)),
                                   np.asarray(ref_out, dtype=np.float32),
                                   rtol=2e-2, atol=2e-2)
        # Valid prefix of the cache must match; tail past T_VALID was never
        # written (aliased, untouched blocks keep their contents).
        presents_np = np.asarray(presents.astype(jnp.float32))
        np.testing.assert_allclose(presents_np[:, :, :, :T_VALID],
                                   np.asarray(ref_presents, dtype=np.float32),
                                   rtol=2e-2, atol=2e-2)
        assert float(np.abs(presents_np[:, :, :, T_VALID:]).max()) == 0.0

    print("KERNEL_OK")
</pallas_src>

<mosaic_0001>
module attributes {stable_mosaic.version = 11 : i64} {
  func.func @_rms_matmul_kernel(%arg0: i32, %arg1: i32, %arg2: i32, %arg3: memref<8x256xbf16, #tpu.memory_space<vmem>>, %arg4: memref<1x256xf32, #tpu.memory_space<vmem>>, %arg5: memref<128x256xbf16, #tpu.memory_space<vmem>>, %arg6: memref<8x256xbf16, #tpu.memory_space<vmem>>, %arg7: memref<8x256xf32, #tpu.memory_space<vmem>>, %arg8: memref<8x1xf32, #tpu.memory_space<vmem>>) attributes {dimension_semantics = [#tpu.dimension_semantics<parallel>, #tpu.dimension_semantics<parallel>, #tpu.dimension_semantics<arbitrary>], iteration_bounds = array<i64: 1, 3, 2>, scalar_prefetch = 0 : i64, scratch_operands = 2 : i64, tpu.core_type = #tpu.core_type<tc>, window_params = [{transform_indices = @transform_0, window_bounds = array<i64: 8, 256>}, {pipeline_mode = #tpu.pipeline_mode<synchronous>, transform_indices = @transform_1, window_bounds = array<i64: 1, 256>}, {transform_indices = @transform_2, window_bounds = array<i64: 128, 256>}, {transform_indices = @transform_3, window_bounds = array<i64: 8, 256>}]} {
    %c0_i32 = arith.constant 0 : i32
    %0 = arith.cmpi eq, %arg2, %c0_i32 : i32
    %1 = arith.extui %0 : i1 to i32
    %c0_i32_0 = arith.constant 0 : i32
    %2 = arith.cmpi ne, %1, %c0_i32_0 : i32
    scf.if %2 {
      %cst_11 = arith.constant 0.000000e+00 : f32
      %24 = vector.broadcast %cst_11 : f32 to vector<8x256xf32>
      %c0_12 = arith.constant 0 : index
      %c0_13 = arith.constant 0 : index
      %25 = vector.load %arg7[%c0_12, %c0_13] : memref<8x256xf32, #tpu.memory_space<vmem>>, vector<8x256xf32>
      tpu.vector_store %arg7[%c0_12, %c0_13], %24 {strides = array<i32>} : memref<8x256xf32, #tpu.memory_space<vmem>>, vector<8x256xf32>,
      %c0_14 = arith.constant 0 : index
      %c0_15 = arith.constant 0 : index
      %26 = vector.load %arg3[%c0_14, %c0_15] : memref<8x256xbf16, #tpu.memory_space<vmem>>, vector<8x256xbf16>
      %27 = arith.extf %26 : vector<8x256xbf16> to vector<8x256xf32>
      %28 = arith.mulf %27, %27 : vector<8x256xf32>
      %cst_16 = arith.constant dense<0.000000e+00> : vector<8xf32>
      %29 = vector.multi_reduction <add>, %28, %cst_16 [1] : vector<8x256xf32> to vector<8xf32>
      %30 = vector.shape_cast %29 : vector<8xf32> to vector<8x1xf32>
      %cst_17 = arith.constant 2.560000e+02 : f32
      %31 = vector.broadcast %cst_17 : f32 to vector<8x1xf32>
      %32 = arith.divf %30, %31 : vector<8x1xf32>
      %cst_18 = arith.constant 9.99999997E-7 : f32
      %33 = vector.broadcast %cst_18 : f32 to vector<8x1xf32>
      %34 = arith.addf %32, %33 : vector<8x1xf32>
      %35 = math.rsqrt %34 : vector<8x1xf32>
      %c0_19 = arith.constant 0 : index
      %c0_20 = arith.constant 0 : index
      %36 = vector.load %arg8[%c0_19, %c0_20] : memref<8x1xf32, #tpu.memory_space<vmem>>, vector<8x1xf32>
      tpu.vector_store %arg8[%c0_19, %c0_20], %35 {strides = array<i32>} : memref<8x1xf32, #tpu.memory_space<vmem>>, vector<8x1xf32>,
    } else {
    }
    %c128_i32 = arith.constant 128 : i32
    %3 = arith.muli %arg2, %c128_i32 : i32
    %4 = tpu.assume_multiple %3, 128 : i32
    %c0 = arith.constant 0 : index
    %5 = arith.index_cast %4 : i32 to index
    %6 = vector.load %arg3[%c0, %5] : memref<8x256xbf16, #tpu.memory_space<vmem>>, vector<8x128xbf16>
    %7 = arith.extf %6 : vector<8x128xbf16> to vector<8x128xf32>
    %c0_1 = arith.constant 0 : index
    %8 = arith.index_cast %4 : i32 to index
    %9 = vector.load %arg4[%c0_1, %8] : memref<1x256xf32, #tpu.memory_space<vmem>>, vector<1x128xf32>
    %c0_2 = arith.constant 0 : index
    %c0_3 = arith.constant 0 : index
    %10 = vector.load %arg8[%c0_2, %c0_3] : memref<8x1xf32, #tpu.memory_space<vmem>>, vector<8x1xf32>
    %11 = vector.broadcast %10 : vector<8x1xf32> to vector<8x128xf32>
    %12 = arith.mulf %7, %11 : vector<8x128xf32>
    %13 = vector.broadcast %9 : vector<1x128xf32> to vector<8x128xf32>
    %14 = arith.mulf %12, %13 : vector<8x128xf32>
    %15 = arith.truncf %14 : vector<8x128xf32> to vector<8x128xbf16>
    %c0_4 = arith.constant 0 : index
    %c0_5 = arith.constant 0 : index
    %16 = vector.load %arg7[%c0_4, %c0_5] : memref<8x256xf32, #tpu.memory_space<vmem>>, vector<8x256xf32>
    %c0_6 = arith.constant 0 : index
    %c0_7 = arith.constant 0 : index
    %17 = vector.load %arg5[%c0_6, %c0_7] : memref<128x256xbf16, #tpu.memory_space<vmem>>, vector<128x256xbf16>
    %cst = arith.constant dense<0.000000e+00> : vector<8x256xf32>
    %18 = tpu.matmul %15, %17, %cst {dimension_numbers = #tpu.dot_dimension_numbers<[1], [0], [0], [1], [0, 0, 1, 1], [], []>} : vector<8x128xbf16>, vector<128x256xbf16>, vector<8x256xf32> -> vector<8x256xf32>
    %19 = arith.addf %16, %18 : vector<8x256xf32>
    %c0_8 = arith.constant 0 : index
    %c0_9 = arith.constant 0 : index
    %20 = vector.load %arg7[%c0_8, %c0_9] : memref<8x256xf32, #tpu.memory_space<vmem>>, vector<8x256xf32>
    tpu.vector_store %arg7[%c0_8, %c0_9], %19 {strides = array<i32>} : memref<8x256xf32, #tpu.memory_space<vmem>>, vector<8x256xf32>,
    %c1_i32 = arith.constant 1 : i32
    %21 = arith.cmpi eq, %arg2, %c1_i32 : i32
    %22 = arith.extui %21 : i1 to i32
    %c0_i32_10 = arith.constant 0 : i32
    %23 = arith.cmpi ne, %22, %c0_i32_10 : i32
    scf.if %23 {
      %c0_11 = arith.constant 0 : index
      %c0_12 = arith.constant 0 : index
      %24 = vector.load %arg7[%c0_11, %c0_12] : memref<8x256xf32, #tpu.memory_space<vmem>>, vector<8x256xf32>
      %25 = arith.truncf %24 : vector<8x256xf32> to vector<8x256xbf16>
      %c0_13 = arith.constant 0 : index
      %c0_14 = arith.constant 0 : index
      %26 = vector.load %arg6[%c0_13, %c0_14] : memref<8x256xbf16, #tpu.memory_space<vmem>>, vector<8x256xbf16>
      tpu.vector_store %arg6[%c0_13, %c0_14], %25 {strides = array<i32>} : memref<8x256xbf16, #tpu.memory_space<vmem>>, vector<8x256xbf16>,
    } else {
    }
    return
  }
  func.func @transform_0(%arg0: i32, %arg1: i32, %arg2: i32) -> (i32, i32) {
    %c0_i32 = arith.constant 0 : i32
    %c0_i32_0 = arith.constant 0 : i32
    return %arg0, %c0_i32 : i32, i32
  }
  func.func @transform_1(%arg0: i32, %arg1: i32, %arg2: i32) -> (i32, i32) {
    %c0_i32 = arith.constant 0 : i32
    %c0_i32_0 = arith.constant 0 : i32
    %c0_i32_1 = arith.constant 0 : i32
    return %c0_i32, %c0_i32_0 : i32, i32
  }
  func.func @transform_2(%arg0: i32, %arg1: i32, %arg2: i32) -> (i32, i32) {
    %c0_i32 = arith.constant 0 : i32
    return %arg2, %arg1 : i32, i32
  }
  func.func @transform_3(%arg0: i32, %arg1: i32, %arg2: i32) -> (i32, i32) {
    %c0_i32 = arith.constant 0 : i32
    return %arg0, %arg1 : i32, i32
  }
}

module attributes {stable_mosaic.version = 11 : i64} {
  func.func @_kv_update_kernel(%arg0: i32, %arg1: i32, %arg2: memref<8x128xbf16, #tpu.memory_space<vmem>>, %arg3: memref<2x1x2x32x128xbf16, #tpu.memory_space<any>>, %arg4: memref<1x1x1x8x128xbf16, #tpu.memory_space<vmem>>) attributes {dimension_semantics = [#tpu.dimension_semantics<arbitrary>, #tpu.dimension_semantics<arbitrary>], iteration_bounds = array<i64: 2, 2>, scalar_prefetch = 0 : i64, scratch_operands = 0 : i64, tpu.core_type = #tpu.core_type<tc>, window_params = [{transform_indices = @transform_0, window_bounds = array<i64: 8, 128>}, {}, {transform_indices = @transform_2, window_bounds = array<i64: 1, 1, 1, 8, 128>}]} {
    %c0 = arith.constant 0 : index
    %c0_0 = arith.constant 0 : index
    %0 = vector.load %arg2[%c0, %c0_0] : memref<8x128xbf16, #tpu.memory_space<vmem>>, vector<8x128xbf16>
    %c0_1 = arith.constant 0 : index
    %c0_2 = arith.constant 0 : index
    %c0_3 = arith.constant 0 : index
    %c0_4 = arith.constant 0 : index
    %c0_5 = arith.constant 0 : index
    %1 = vector.load %arg4[%c0_1, %c0_2, %c0_3, %c0_4, %c0_5] : memref<1x1x1x8x128xbf16, #tpu.memory_space<vmem>>, vector<1x1x1x8x128xbf16>
    %2 = vector.shape_cast %1 : vector<1x1x1x8x128xbf16> to vector<8x128xbf16>
    %3 = vector.shape_cast %0 : vector<8x128xbf16> to vector<1x1x1x8x128xbf16>
    tpu.vector_store %arg4[%c0_1, %c0_2, %c0_3, %c0_4, %c0_5], %3 {strides = array<i32>} : memref<1x1x1x8x128xbf16, #tpu.memory_space<vmem>>, vector<1x1x1x8x128xbf16>,
    return
  }
  func.func @transform_0(%arg0: i32, %arg1: i32) -> (i32, i32) {
    %c1_i32 = arith.constant 1 : i32
    %0 = arith.addi %arg0, %c1_i32 : i32
    %c2_i32 = arith.constant 2 : i32
    %1 = arith.muli %0, %c2_i32 : i32
    %2 = arith.addi %1, %arg1 : i32
    %c0_i32 = arith.constant 0 : i32
    %c0_i32_0 = arith.constant 0 : i32
    return %c0_i32, %2 : i32, i32
  }
  func.func @transform_2(%arg0: i32, %arg1: i32) -> (i32, i32, i32, i32, i32) {
    %c0_i32 = arith.constant 0 : i32
    %c1_i32 = arith.constant 1 : i32
    %c0_i32_0 = arith.constant 0 : i32
    %c0_i32_1 = arith.constant 0 : i32
    return %arg0, %c0_i32, %arg1, %c1_i32, %c0_i32_0 : i32, i32, i32, i32, i32
  }
}

module attributes {stable_mosaic.version = 11 : i64} {
  func.func @_attn_kernel(%arg0: i32, %arg1: i32, %arg2: i32, %arg3: memref<2x8x128xbf16, #tpu.memory_space<vmem>>, %arg4: memref<2x1xf32, #tpu.memory_space<vmem>>, %arg5: memref<2x1x2x8x128xbf16, #tpu.memory_space<vmem>>, %arg6: memref<2x8x128xbf16, #tpu.memory_space<vmem>>, %arg7: memref<2x8x1xf32, #tpu.memory_space<vmem>>, %arg8: memref<2x8x1xf32, #tpu.memory_space<vmem>>, %arg9: memref<2x8x128xf32, #tpu.memory_space<vmem>>) attributes {dimension_semantics = [#tpu.dimension_semantics<parallel>, #tpu.dimension_semantics<parallel>, #tpu.dimension_semantics<arbitrary>], iteration_bounds = array<i64: 1, 1, 4>, scalar_prefetch = 0 : i64, scratch_operands = 3 : i64, tpu.core_type = #tpu.core_type<tc>, window_params = [{transform_indices = @transform_0, window_bounds = array<i64: 2, 8, 128>}, {transform_indices = @transform_1, window_bounds = array<i64: 2, 1>}, {transform_indices = @transform_2, window_bounds = array<i64: 2, 1, 2, 8, 128>}, {transform_indices = @transform_3, window_bounds = array<i64: 2, 8, 128>}]} {
    %c0_i32 = arith.constant 0 : i32
    %0 = arith.cmpi eq, %arg2, %c0_i32 : i32
    %1 = arith.extui %0 : i1 to i32
    %c0_i32_0 = arith.constant 0 : i32
    %2 = arith.cmpi ne, %1, %c0_i32_0 : i32
    scf.if %2 {
      %cst = arith.constant -1.000000e+30 : f32
      %14 = vector.broadcast %cst : f32 to vector<2x8x1xf32>
      %c0 = arith.constant 0 : index
      %c0_6 = arith.constant 0 : index
      %c0_7 = arith.constant 0 : index
      %15 = vector.load %arg7[%c0, %c0_6, %c0_7] : memref<2x8x1xf32, #tpu.memory_space<vmem>>, vector<2x8x1xf32>
      tpu.vector_store %arg7[%c0, %c0_6, %c0_7], %14 {strides = array<i32>} : memref<2x8x1xf32, #tpu.memory_space<vmem>>, vector<2x8x1xf32>,
      %cst_8 = arith.constant 0.000000e+00 : f32
      %16 = vector.broadcast %cst_8 : f32 to vector<2x8x1xf32>
      %c0_9 = arith.constant 0 : index
      %c0_10 = arith.constant 0 : index
      %c0_11 = arith.constant 0 : index
      %17 = vector.load %arg8[%c0_9, %c0_10, %c0_11] : memref<2x8x1xf32, #tpu.memory_space<vmem>>, vector<2x8x1xf32>
      tpu.vector_store %arg8[%c0_9, %c0_10, %c0_11], %16 {strides = array<i32>} : memref<2x8x1xf32, #tpu.memory_space<vmem>>, vector<2x8x1xf32>,
      %cst_12 = arith.constant 0.000000e+00 : f32
      %18 = vector.broadcast %cst_12 : f32 to vector<2x8x128xf32>
      %c0_13 = arith.constant 0 : index
      %c0_14 = arith.constant 0 : index
      %c0_15 = arith.constant 0 : index
      %19 = vector.load %arg9[%c0_13, %c0_14, %c0_15] : memref<2x8x128xf32, #tpu.memory_space<vmem>>, vector<2x8x128xf32>
      tpu.vector_store %arg9[%c0_13, %c0_14, %c0_15], %18 {strides = array<i32>} : memref<2x8x128xf32, #tpu.memory_space<vmem>>, vector<2x8x128xf32>,
    } else {
    }
    %c8_i32 = arith.constant 8 : i32
    %3 = arith.muli %arg2, %c8_i32 : i32
    %c1_i32 = arith.constant 1 : i32
    %4 = arith.addi %arg1, %c1_i32 : i32
    %c8_i32_1 = arith.constant 8 : i32
    %5 = arith.muli %4, %c8_i32_1 : i32
    %c8_i32_2 = arith.constant 8 : i32
    %6 = arith.addi %c8_i32_2, %5 : i32
    %c1_i32_3 = arith.constant 1 : i32
    %7 = arith.subi %6, %c1_i32_3 : i32
    %8 = arith.cmpi sle, %3, %7 : i32
    %9 = arith.extui %8 : i1 to i32
    %c0_i32_4 = arith.constant 0 : i32
    %10 = arith.cmpi ne, %9, %c0_i32_4 : i32
    scf.if %10 {
      %c0 = arith.constant 0 : index
      %c0_6 = arith.constant 0 : index
      %c0_7 = arith.constant 0 : index
      %14 = vector.load %arg3[%c0, %c0_6, %c0_7] : memref<2x8x128xbf16, #tpu.memory_space<vmem>>, vector<2x8x128xbf16>
      %c0_8 = arith.constant 0 : index
      %c0_9 = arith.constant 0 : index
      %c0_10 = arith.constant 0 : index
      %c0_11 = arith.constant 0 : index
      %c0_12 = arith.constant 0 : index
      %15 = vector.load %arg5[%c0_8, %c0_9, %c0_10, %c0_11, %c0_12] : memref<2x1x2x8x128xbf16, #tpu.memory_space<vmem>>, vector<1x1x2x8x128xbf16>
      %16 = vector.shape_cast %15 : vector<1x1x2x8x128xbf16> to vector<2x8x128xbf16>
      %c1 = arith.constant 1 : index
      %c0_13 = arith.constant 0 : index
      %c0_14 = arith.constant 0 : index
      %c0_15 = arith.constant 0 : index
      %c0_16 = arith.constant 0 : index
      %17 = vector.load %arg5[%c1, %c0_13, %c0_14, %c0_15, %c0_16] : memref<2x1x2x8x128xbf16, #tpu.memory_space<vmem>>, vector<1x1x2x8x128xbf16>
      %18 = vector.shape_cast %17 : vector<1x1x2x8x128xbf16> to vector<2x8x128xbf16>
      "tpu.trace_start"() <{level = 10 : i32, message = "gqd,gkd->gqk"}> : () -> ()
      %cst = arith.constant dense<0.000000e+00> : vector<2x8x8xf32>
      %19 = tpu.matmul %14, %16, %cst {dimension_numbers = #tpu.dot_dimension_numbers<[2], [2], [1], [1], [0, 0, 0, 1, 1, 1], [0], [0]>} : vector<2x8x128xbf16>, vector<2x8x128xbf16>, vector<2x8x8xf32> -> vector<2x8x8xf32>
      "tpu.trace_stop"() : () -> ()
      %cst_17 = arith.constant 0.0883883461 : f32
      %20 = vector.broadcast %cst_17 : f32 to vector<2x8x8xf32>
      %21 = arith.mulf %19, %20 : vector<2x8x8xf32>
      %22 = tpu.iota {dimensions = array<i32: 0>} : vector<8x8xi32>
      %23 = tpu.iota {dimensions = array<i32: 1>} : vector<8x8xi32>
      %c8_i32_18 = arith.constant 8 : i32
      %24 = arith.muli %arg1, %c8_i32_18 : i32
      %c8_i32_19 = arith.constant 8 : i32
      %25 = arith.addi %c8_i32_19, %24 : i32
      %26 = vector.broadcast %25 : i32 to vector<8x8xi32>
      %27 = arith.addi %26, %22 : vector<8x8xi32>
      %c8_i32_20 = arith.constant 8 : i32
      %28 = arith.muli %arg2, %c8_i32_20 : i32
      %29 = vector.broadcast %28 : i32 to vector<8x8xi32>
      %30 = arith.addi %29, %23 : vector<8x8xi32>
      %c0_21 = arith.constant 0 : index
      %c0_22 = arith.constant 0 : index
      %31 = vector.load %arg4[%c0_21, %c0_22] : memref<2x1xf32, #tpu.memory_space<vmem>>, vector<2x1xf32>
      %32 = vector.shape_cast %31 : vector<2x1xf32> to vector<2x1x1xf32>
      %cst_23 = arith.constant 0.000000e+00 : f32
      %33 = vector.broadcast %cst_23 : f32 to vector<2x1x1xf32>
      %34 = arith.subf %33, %32 : vector<2x1x1xf32>
      %35 = arith.subi %27, %30 : vector<8x8xi32>
      %36 = arith.sitofp %35 : vector<8x8xi32> to vector<8x8xf32>
      %37 = vector.shape_cast %36 : vector<8x8xf32> to vector<1x8x8xf32>
      %38 = vector.broadcast %34 : vector<2x1x1xf32> to vector<2x8x8xf32>
      %39 = vector.broadcast %37 : vector<1x8x8xf32> to vector<2x8x8xf32>
      %40 = arith.mulf %38, %39 : vector<2x8x8xf32>
      %41 = arith.cmpi sle, %30, %27 : vector<8x8xi32>
      %42 = vector.shape_cast %41 : vector<8x8xi1> to vector<1x8x8xi1>
      %cst_24 = arith.constant -1.000000e+09 : f32
      %43 = vector.shape_cast %42 : vector<1x8x8xi1> to vector<1x8x8xi1>
      %44 = vector.broadcast %43 : vector<1x8x8xi1> to vector<2x8x8xi1>
      %45 = vector.broadcast %cst_24 : f32 to vector<2x8x8xf32>
      %46 = arith.select %44, %40, %45 : vector<2x8x8xi1>, vector<2x8x8xf32>
      %47 = arith.addf %21, %46 : vector<2x8x8xf32>
      %c0_25 = arith.constant 0 : index
      %c0_26 = arith.constant 0 : index
      %c0_27 = arith.constant 0 : index
      %48 = vector.load %arg7[%c0_25, %c0_26, %c0_27] : memref<2x8x1xf32, #tpu.memory_space<vmem>>, vector<2x8x1xf32>
      %cst_28 = arith.constant dense<0xFF800000> : vector<2x8xf32>
      %49 = vector.multi_reduction <maximumf>, %47, %cst_28 [2] : vector<2x8x8xf32> to vector<2x8xf32>
      %50 = vector.shape_cast %49 : vector<2x8xf32> to vector<2x8x1xf32>
      %51 = arith.maximumf %48, %50 : vector<2x8x1xf32>
      %52 = arith.subf %48, %51 : vector<2x8x1xf32>
      %53 = math.exp %52 : vector<2x8x1xf32>
      %54 = vector.broadcast %51 : vector<2x8x1xf32> to vector<2x8x8xf32>
      %55 = arith.subf %47, %54 : vector<2x8x8xf32>
      %56 = math.exp %55 : vector<2x8x8xf32>
      %c0_29 = arith.constant 0 : index
      %c0_30 = arith.constant 0 : index
      %c0_31 = arith.constant 0 : index
      %57 = vector.load %arg8[%c0_29, %c0_30, %c0_31] : memref<2x8x1xf32, #tpu.memory_space<vmem>>, vector<2x8x1xf32>
      %58 = arith.mulf %53, %57 : vector<2x8x1xf32>
      %cst_32 = arith.constant dense<0.000000e+00> : vector<2x8xf32>
      %59 = vector.multi_reduction <add>, %56, %cst_32 [2] : vector<2x8x8xf32> to vector<2x8xf32>
      %60 = vector.shape_cast %59 : vector<2x8xf32> to vector<2x8x1xf32>
      %61 = arith.addf %58, %60 : vector<2x8x1xf32>
      %c0_33 = arith.constant 0 : index
      %c0_34 = arith.constant 0 : index
      %c0_35 = arith.constant 0 : index
      %62 = vector.load %arg8[%c0_33, %c0_34, %c0_35] : memref<2x8x1xf32, #tpu.memory_space<vmem>>, vector<2x8x1xf32>
      tpu.vector_store %arg8[%c0_33, %c0_34, %c0_35], %61 {strides = array<i32>} : memref<2x8x1xf32, #tpu.memory_space<vmem>>, vector<2x8x1xf32>,
      %c0_36 = arith.constant 0 : index
      %c0_37 = arith.constant 0 : index
      %c0_38 = arith.constant 0 : index
      %63 = vector.load %arg9[%c0_36, %c0_37, %c0_38] : memref<2x8x128xf32, #tpu.memory_space<vmem>>, vector<2x8x128xf32>
      %64 = vector.broadcast %53 : vector<2x8x1xf32> to vector<2x8x128xf32>
      %65 = arith.mulf %64, %63 : vector<2x8x128xf32>
      %66 = arith.truncf %56 : vector<2x8x8xf32> to vector<2x8x8xbf16>
      "tpu.trace_start"() <{level = 10 : i32, message = "gqk,gkd->gqd"}> : () -> ()
      %cst_39 = arith.constant dense<0.000000e+00> : vector<2x8x128xf32>
      %67 = tpu.matmul %66, %18, %cst_39 {dimension_numbers = #tpu.dot_dimension_numbers<[2], [1], [1], [2], [0, 0, 0, 1, 1, 2], [0], [0]>} : vector<2x8x8xbf16>, vector<2x8x128xbf16>, vector<2x8x128xf32> -> vector<2x8x128xf32>
      "tpu.trace_stop"() : () -> ()
      %68 = arith.addf %65, %67 : vector<2x8x128xf32>
      %c0_40 = arith.constant 0 : index
      %c0_41 = arith.constant 0 : index
      %c0_42 = arith.constant 0 : index
      %69 = vector.load %arg9[%c0_40, %c0_41, %c0_42] : memref<2x8x128xf32, #tpu.memory_space<vmem>>, vector<2x8x128xf32>
      tpu.vector_store %arg9[%c0_40, %c0_41, %c0_42], %68 {strides = array<i32>} : memref<2x8x128xf32, #tpu.memory_space<vmem>>, vector<2x8x128xf32>,
      %c0_43 = arith.constant 0 : index
      %c0_44 = arith.constant 0 : index
      %c0_45 = arith.constant 0 : index
      %70 = vector.load %arg7[%c0_43, %c0_44, %c0_45] : memref<2x8x1xf32, #tpu.memory_space<vmem>>, vector<2x8x1xf32>
      tpu.vector_store %arg7[%c0_43, %c0_44, %c0_45], %51 {strides = array<i32>} : memref<2x8x1xf32, #tpu.memory_space<vmem>>, vector<2x8x1xf32>,
    } else {
    }
    %c3_i32 = arith.constant 3 : i32
    %11 = arith.cmpi eq, %arg2, %c3_i32 : i32
    %12 = arith.extui %11 : i1 to i32
    %c0_i32_5 = arith.constant 0 : i32
    %13 = arith.cmpi ne, %12, %c0_i32_5 : i32
    scf.if %13 {
      %c0 = arith.constant 0 : index
      %c0_6 = arith.constant 0 : index
      %c0_7 = arith.constant 0 : index
      %14 = vector.load %arg9[%c0, %c0_6, %c0_7] : memref<2x8x128xf32, #tpu.memory_space<vmem>>, vector<2x8x128xf32>
      %c0_8 = arith.constant 0 : index
      %c0_9 = arith.constant 0 : index
      %c0_10 = arith.constant 0 : index
      %15 = vector.load %arg8[%c0_8, %c0_9, %c0_10] : memref<2x8x1xf32, #tpu.memory_space<vmem>>, vector<2x8x1xf32>
      %16 = tpu.reciprocal %15 {approx = true} : vector<2x8x1xf32> -> vector<2x8x1xf32>
      %17 = vector.broadcast %16 : vector<2x8x1xf32> to vector<2x8x128xf32>
      %18 = arith.mulf %14, %17 : vector<2x8x128xf32>
      %19 = arith.truncf %18 : vector<2x8x128xf32> to vector<2x8x128xbf16>
      %c0_11 = arith.constant 0 : index
      %c0_12 = arith.constant 0 : index
      %c0_13 = arith.constant 0 : index
      %20 = vector.load %arg6[%c0_11, %c0_12, %c0_13] : memref<2x8x128xbf16, #tpu.memory_space<vmem>>, vector<2x8x128xbf16>
      tpu.vector_store %arg6[%c0_11, %c0_12, %c0_13], %19 {strides = array<i32>} : memref<2x8x128xbf16, #tpu.memory_space<vmem>>, vector<2x8x128xbf16>,
    } else {
    }
    return
  }
  func.func @transform_0(%arg0: i32, %arg1: i32, %arg2: i32) -> (i32, i32, i32) {
    %c0_i32 = arith.constant 0 : i32
    %c0_i32_0 = arith.constant 0 : i32
    return %arg0, %arg1, %c0_i32 : i32, i32, i32
  }
  func.func @transform_1(%arg0: i32, %arg1: i32, %arg2: i32) -> (i32, i32) {
    %c0_i32 = arith.constant 0 : i32
    %c0_i32_0 = arith.constant 0 : i32
    return %arg0, %c0_i32 : i32, i32
  }
  func.func @transform_2(%arg0: i32, %arg1: i32, %arg2: i32) -> (i32, i32, i32, i32, i32) {
    %c0_i32 = arith.constant 0 : i32
    %c0_i32_0 = arith.constant 0 : i32
    %c0_i32_1 = arith.constant 0 : i32
    %c0_i32_2 = arith.constant 0 : i32
    return %c0_i32, %c0_i32_0, %arg0, %arg2, %c0_i32_1 : i32, i32, i32, i32, i32
  }
  func.func @transform_3(%arg0: i32, %arg1: i32, %arg2: i32) -> (i32, i32, i32) {
    %c0_i32 = arith.constant 0 : i32
    %c0_i32_0 = arith.constant 0 : i32
    return %arg0, %arg1, %c0_i32 : i32, i32, i32
  }
}

module attributes {stable_mosaic.version = 11 : i64} {
  func.func @_matmul_residual_kernel(%arg0: i32, %arg1: i32, %arg2: i32, %arg3: memref<8x128xbf16, #tpu.memory_space<vmem>>, %arg4: memref<128x256xbf16, #tpu.memory_space<vmem>>, %arg5: memref<8x256xbf16, #tpu.memory_space<vmem>>, %arg6: memref<8x256xbf16, #tpu.memory_space<vmem>>, %arg7: memref<8x256xf32, #tpu.memory_space<vmem>>) attributes {dimension_semantics = [#tpu.dimension_semantics<parallel>, #tpu.dimension_semantics<parallel>, #tpu.dimension_semantics<arbitrary>], iteration_bounds = array<i64: 1, 1, 2>, scalar_prefetch = 0 : i64, scratch_operands = 1 : i64, tpu.core_type = #tpu.core_type<tc>, window_params = [{transform_indices = @transform_0, window_bounds = array<i64: 8, 128>}, {transform_indices = @transform_1, window_bounds = array<i64: 128, 256>}, {transform_indices = @transform_2, window_bounds = array<i64: 8, 256>}, {transform_indices = @transform_3, window_bounds = array<i64: 8, 256>}]} {
    %c0_i32 = arith.constant 0 : i32
    %0 = arith.cmpi eq, %arg2, %c0_i32 : i32
    %1 = arith.extui %0 : i1 to i32
    %c0_i32_0 = arith.constant 0 : i32
    %2 = arith.cmpi ne, %1, %c0_i32_0 : i32
    scf.if %2 {
      %cst_9 = arith.constant 0.000000e+00 : f32
      %12 = vector.broadcast %cst_9 : f32 to vector<8x256xf32>
      %c0_10 = arith.constant 0 : index
      %c0_11 = arith.constant 0 : index
      %13 = vector.load %arg7[%c0_10, %c0_11] : memref<8x256xf32, #tpu.memory_space<vmem>>, vector<8x256xf32>
      tpu.vector_store %arg7[%c0_10, %c0_11], %12 {strides = array<i32>} : memref<8x256xf32, #tpu.memory_space<vmem>>, vector<8x256xf32>,
    } else {
    }
    %c0 = arith.constant 0 : index
    %c0_1 = arith.constant 0 : index
    %3 = vector.load %arg7[%c0, %c0_1] : memref<8x256xf32, #tpu.memory_space<vmem>>, vector<8x256xf32>
    %c0_2 = arith.constant 0 : index
    %c0_3 = arith.constant 0 : index
    %4 = vector.load %arg3[%c0_2, %c0_3] : memref<8x128xbf16, #tpu.memory_space<vmem>>, vector<8x128xbf16>
    %c0_4 = arith.constant 0 : index
    %c0_5 = arith.constant 0 : index
    %5 = vector.load %arg4[%c0_4, %c0_5] : memref<128x256xbf16, #tpu.memory_space<vmem>>, vector<128x256xbf16>
    %cst = arith.constant dense<0.000000e+00> : vector<8x256xf32>
    %6 = tpu.matmul %4, %5, %cst {dimension_numbers = #tpu.dot_dimension_numbers<[1], [0], [0], [1], [0, 0, 1, 1], [], []>} : vector<8x128xbf16>, vector<128x256xbf16>, vector<8x256xf32> -> vector<8x256xf32>
    %7 = arith.addf %3, %6 : vector<8x256xf32>
    %c0_6 = arith.constant 0 : index
    %c0_7 = arith.constant 0 : index
    %8 = vector.load %arg7[%c0_6, %c0_7] : memref<8x256xf32, #tpu.memory_space<vmem>>, vector<8x256xf32>
    tpu.vector_store %arg7[%c0_6, %c0_7], %7 {strides = array<i32>} : memref<8x256xf32, #tpu.memory_space<vmem>>, vector<8x256xf32>,
    %c1_i32 = arith.constant 1 : i32
    %9 = arith.cmpi eq, %arg2, %c1_i32 : i32
    %10 = arith.extui %9 : i1 to i32
    %c0_i32_8 = arith.constant 0 : i32
    %11 = arith.cmpi ne, %10, %c0_i32_8 : i32
    scf.if %11 {
      %c0_9 = arith.constant 0 : index
      %c0_10 = arith.constant 0 : index
      %12 = vector.load %arg5[%c0_9, %c0_10] : memref<8x256xbf16, #tpu.memory_space<vmem>>, vector<8x256xbf16>
      %13 = arith.extf %12 : vector<8x256xbf16> to vector<8x256xf32>
      %c0_11 = arith.constant 0 : index
      %c0_12 = arith.constant 0 : index
      %14 = vector.load %arg7[%c0_11, %c0_12] : memref<8x256xf32, #tpu.memory_space<vmem>>, vector<8x256xf32>
      %15 = arith.addf %13, %14 : vector<8x256xf32>
      %16 = arith.truncf %15 : vector<8x256xf32> to vector<8x256xbf16>
      %c0_13 = arith.constant 0 : index
      %c0_14 = arith.constant 0 : index
      %17 = vector.load %arg6[%c0_13, %c0_14] : memref<8x256xbf16, #tpu.memory_space<vmem>>, vector<8x256xbf16>
      tpu.vector_store %arg6[%c0_13, %c0_14], %16 {strides = array<i32>} : memref<8x256xbf16, #tpu.memory_space<vmem>>, vector<8x256xbf16>,
    } else {
    }
    return
  }
  func.func @transform_0(%arg0: i32, %arg1: i32, %arg2: i32) -> (i32, i32) {
    %c0_i32 = arith.constant 0 : i32
    return %arg0, %arg2 : i32, i32
  }
  func.func @transform_1(%arg0: i32, %arg1: i32, %arg2: i32) -> (i32, i32) {
    %c0_i32 = arith.constant 0 : i32
    return %arg2, %arg1 : i32, i32
  }
  func.func @transform_2(%arg0: i32, %arg1: i32, %arg2: i32) -> (i32, i32) {
    %c0_i32 = arith.constant 0 : i32
    return %arg0, %arg1 : i32, i32
  }
  func.func @transform_3(%arg0: i32, %arg1: i32, %arg2: i32) -> (i32, i32) {
    %c0_i32 = arith.constant 0 : i32
    return %arg0, %arg1 : i32, i32
  }
}

module attributes {stable_mosaic.version = 11 : i64} {
  func.func @_rms_mlp_kernel(%arg0: i32, %arg1: i32, %arg2: memref<8x256xbf16, #tpu.memory_space<vmem>>, %arg3: memref<1x256xf32, #tpu.memory_space<vmem>>, %arg4: memref<256x256xbf16, #tpu.memory_space<vmem>>, %arg5: memref<256x256xbf16, #tpu.memory_space<vmem>>, %arg6: memref<256x256xbf16, #tpu.memory_space<vmem>>, %arg7: memref<8x256xbf16, #tpu.memory_space<vmem>>, %arg8: memref<8x256xbf16, #tpu.memory_space<vmem>>, %arg9: memref<8x256xf32, #tpu.memory_space<vmem>>, %arg10: memref<8x256xbf16, #tpu.memory_space<vmem>>) attributes {dimension_semantics = [#tpu.dimension_semantics<parallel>, #tpu.dimension_semantics<arbitrary>], iteration_bounds = array<i64: 1, 2>, scalar_prefetch = 0 : i64, scratch_operands = 2 : i64, tpu.core_type = #tpu.core_type<tc>, window_params = [{transform_indices = @transform_0, window_bounds = array<i64: 8, 256>}, {pipeline_mode = #tpu.pipeline_mode<synchronous>, transform_indices = @transform_1, window_bounds = array<i64: 1, 256>}, {transform_indices = @transform_2, window_bounds = array<i64: 256, 256>}, {transform_indices = @transform_3, window_bounds = array<i64: 256, 256>}, {transform_indices = @transform_4, window_bounds = array<i64: 256, 256>}, {transform_indices = @transform_5, window_bounds = array<i64: 8, 256>}, {transform_indices = @transform_6, window_bounds = array<i64: 8, 256>}]} {
    %c0_i32 = arith.constant 0 : i32
    %0 = arith.cmpi eq, %arg1, %c0_i32 : i32
    %1 = arith.extui %0 : i1 to i32
    %c0_i32_0 = arith.constant 0 : i32
    %2 = arith.cmpi ne, %1, %c0_i32_0 : i32
    scf.if %2 {
      %cst_16 = arith.constant 0.000000e+00 : f32
      %24 = vector.broadcast %cst_16 : f32 to vector<8x256xf32>
      %c0_17 = arith.constant 0 : index
      %c0_18 = arith.constant 0 : index
      %25 = vector.load %arg9[%c0_17, %c0_18] : memref<8x256xf32, #tpu.memory_space<vmem>>, vector<8x256xf32>
      tpu.vector_store %arg9[%c0_17, %c0_18], %24 {strides = array<i32>} : memref<8x256xf32, #tpu.memory_space<vmem>>, vector<8x256xf32>,
      %c0_19 = arith.constant 0 : index
      %c0_20 = arith.constant 0 : index
      %26 = vector.load %arg2[%c0_19, %c0_20] : memref<8x256xbf16, #tpu.memory_space<vmem>>, vector<8x256xbf16>
      %27 = arith.extf %26 : vector<8x256xbf16> to vector<8x256xf32>
      %28 = arith.mulf %27, %27 : vector<8x256xf32>
      %cst_21 = arith.constant dense<0.000000e+00> : vector<8xf32>
      %29 = vector.multi_reduction <add>, %28, %cst_21 [1] : vector<8x256xf32> to vector<8xf32>
      %30 = vector.shape_cast %29 : vector<8xf32> to vector<8x1xf32>
      %cst_22 = arith.constant 2.560000e+02 : f32
      %31 = vector.broadcast %cst_22 : f32 to vector<8x1xf32>
      %32 = arith.divf %30, %31 : vector<8x1xf32>
      %cst_23 = arith.constant 9.99999997E-7 : f32
      %33 = vector.broadcast %cst_23 : f32 to vector<8x1xf32>
      %34 = arith.addf %32, %33 : vector<8x1xf32>
      %35 = math.rsqrt %34 : vector<8x1xf32>
      %36 = vector.broadcast %35 : vector<8x1xf32> to vector<8x256xf32>
      %37 = arith.mulf %27, %36 : vector<8x256xf32>
      %c0_24 = arith.constant 0 : index
      %c0_25 = arith.constant 0 : index
      %38 = vector.load %arg3[%c0_24, %c0_25] : memref<1x256xf32, #tpu.memory_space<vmem>>, vector<1x256xf32>
      %39 = vector.broadcast %38 : vector<1x256xf32> to vector<8x256xf32>
      %40 = arith.mulf %37, %39 : vector<8x256xf32>
      %41 = arith.truncf %40 : vector<8x256xf32> to vector<8x256xbf16>
      %c0_26 = arith.constant 0 : index
      %c0_27 = arith.constant 0 : index
      %42 = vector.load %arg10[%c0_26, %c0_27] : memref<8x256xbf16, #tpu.memory_space<vmem>>, vector<8x256xbf16>
      tpu.vector_store %arg10[%c0_26, %c0_27], %41 {strides = array<i32>} : memref<8x256xbf16, #tpu.memory_space<vmem>>, vector<8x256xbf16>,
    } else {
    }
    %c0 = arith.constant 0 : index
    %c0_1 = arith.constant 0 : index
    %3 = vector.load %arg10[%c0, %c0_1] : memref<8x256xbf16, #tpu.memory_space<vmem>>, vector<8x256xbf16>
    %c0_2 = arith.constant 0 : index
    %c0_3 = arith.constant 0 : index
    %4 = vector.load %arg4[%c0_2, %c0_3] : memref<256x256xbf16, #tpu.memory_space<vmem>>, vector<256x256xbf16>
    %cst = arith.constant dense<0.000000e+00> : vector<8x256xf32>
    %5 = tpu.matmul %3, %4, %cst {dimension_numbers = #tpu.dot_dimension_numbers<[1], [0], [0], [1], [0, 0, 1, 1], [], []>} : vector<8x256xbf16>, vector<256x256xbf16>, vector<8x256xf32> -> vector<8x256xf32>
    %c0_4 = arith.constant 0 : index
    %c0_5 = arith.constant 0 : index
    %6 = vector.load %arg5[%c0_4, %c0_5] : memref<256x256xbf16, #tpu.memory_space<vmem>>, vector<256x256xbf16>
    %cst_6 = arith.constant dense<0.000000e+00> : vector<8x256xf32>
    %7 = tpu.matmul %3, %6, %cst_6 {dimension_numbers = #tpu.dot_dimension_numbers<[1], [0], [0], [1], [0, 0, 1, 1], [], []>} : vector<8x256xbf16>, vector<256x256xbf16>, vector<8x256xf32> -> vector<8x256xf32>
    %8 = arith.negf %5 : vector<8x256xf32>
    %9 = math.exp %8 : vector<8x256xf32>
    %cst_7 = arith.constant 1.000000e+00 : f32
    %10 = vector.broadcast %cst_7 : f32 to vector<8x256xf32>
    %11 = arith.addf %10, %9 : vector<8x256xf32>
    %12 = arith.divf %10, %11 : vector<8x256xf32>
    %13 = arith.mulf %5, %12 : vector<8x256xf32>
    %14 = arith.mulf %13, %7 : vector<8x256xf32>
    %c0_8 = arith.constant 0 : index
    %c0_9 = arith.constant 0 : index
    %15 = vector.load %arg9[%c0_8, %c0_9] : memref<8x256xf32, #tpu.memory_space<vmem>>, vector<8x256xf32>
    %16 = arith.truncf %14 : vector<8x256xf32> to vector<8x256xbf16>
    %c0_10 = arith.constant 0 : index
    %c0_11 = arith.constant 0 : index
    %17 = vector.load %arg6[%c0_10, %c0_11] : memref<256x256xbf16, #tpu.memory_space<vmem>>, vector<256x256xbf16>
    %cst_12 = arith.constant dense<0.000000e+00> : vector<8x256xf32>
    %18 = tpu.matmul %16, %17, %cst_12 {dimension_numbers = #tpu.dot_dimension_numbers<[1], [0], [0], [1], [0, 0, 1, 1], [], []>} : vector<8x256xbf16>, vector<256x256xbf16>, vector<8x256xf32> -> vector<8x256xf32>
    %19 = arith.addf %15, %18 : vector<8x256xf32>
    %c0_13 = arith.constant 0 : index
    %c0_14 = arith.constant 0 : index
    %20 = vector.load %arg9[%c0_13, %c0_14] : memref<8x256xf32, #tpu.memory_space<vmem>>, vector<8x256xf32>
    tpu.vector_store %arg9[%c0_13, %c0_14], %19 {strides = array<i32>} : memref<8x256xf32, #tpu.memory_space<vmem>>, vector<8x256xf32>,
    %c1_i32 = arith.constant 1 : i32
    %21 = arith.cmpi eq, %arg1, %c1_i32 : i32
    %22 = arith.extui %21 : i1 to i32
    %c0_i32_15 = arith.constant 0 : i32
    %23 = arith.cmpi ne, %22, %c0_i32_15 : i32
    scf.if %23 {
      %c0_16 = arith.constant 0 : index
      %c0_17 = arith.constant 0 : index
      %24 = vector.load %arg7[%c0_16, %c0_17] : memref<8x256xbf16, #tpu.memory_space<vmem>>, vector<8x256xbf16>
      %25 = arith.extf %24 : vector<8x256xbf16> to vector<8x256xf32>
      %c0_18 = arith.constant 0 : index
      %c0_19 = arith.constant 0 : index
      %26 = vector.load %arg9[%c0_18, %c0_19] : memref<8x256xf32, #tpu.memory_space<vmem>>, vector<8x256xf32>
      %27 = arith.addf %25, %26 : vector<8x256xf32>
      %28 = arith.truncf %27 : vector<8x256xf32> to vector<8x256xbf16>
      %c0_20 = arith.constant 0 : index
      %c0_21 = arith.constant 0 : index
      %29 = vector.load %arg8[%c0_20, %c0_21] : memref<8x256xbf16, #tpu.memory_space<vmem>>, vector<8x256xbf16>
      tpu.vector_store %arg8[%c0_20, %c0_21], %28 {strides = array<i32>} : memref<8x256xbf16, #tpu.memory_space<vmem>>, vector<8x256xbf16>,
    } else {
    }
    return
  }
  func.func @transform_0(%arg0: i32, %arg1: i32) -> (i32, i32) {
    %c0_i32 = arith.constant 0 : i32
    %c0_i32_0 = arith.constant 0 : i32
    return %arg0, %c0_i32 : i32, i32
  }
  func.func @transform_1(%arg0: i32, %arg1: i32) -> (i32, i32) {
    %c0_i32 = arith.constant 0 : i32
    %c0_i32_0 = arith.constant 0 : i32
    %c0_i32_1 = arith.constant 0 : i32
    return %c0_i32, %c0_i32_0 : i32, i32
  }
  func.func @transform_2(%arg0: i32, %arg1: i32) -> (i32, i32) {
    %c0_i32 = arith.constant 0 : i32
    %c0_i32_0 = arith.constant 0 : i32
    return %c0_i32, %arg1 : i32, i32
  }
  func.func @transform_3(%arg0: i32, %arg1: i32) -> (i32, i32) {
    %c0_i32 = arith.constant 0 : i32
    %c0_i32_0 = arith.constant 0 : i32
    return %c0_i32, %arg1 : i32, i32
  }
  func.func @transform_4(%arg0: i32, %arg1: i32) -> (i32, i32) {
    %c0_i32 = arith.constant 0 : i32
    %c0_i32_0 = arith.constant 0 : i32
    return %arg1, %c0_i32 : i32, i32
  }
  func.func @transform_5(%arg0: i32, %arg1: i32) -> (i32, i32) {
    %c0_i32 = arith.constant 0 : i32
    %c0_i32_0 = arith.constant 0 : i32
    return %arg0, %c0_i32 : i32, i32
  }
  func.func @transform_6(%arg0: i32, %arg1: i32) -> (i32, i32) {
    %c0_i32 = arith.constant 0 : i32
    %c0_i32_0 = arith.constant 0 : i32
    return %arg0, %c0_i32 : i32, i32
  }
}

</mosaic_0001>

<bundles_post_ra>
// kernel: baichuan2_block_forward.6
= control target key start
LH: loop header
LB: loop body
LE: loop exit
PB: predicated region body
PF: predicated region fallthrough
CT: control target
= control target key end

     0   :  { %s370_s9 = smov 0   ;;  %s372_s10 = smov 0   ;;  %s415_s0 = inlined_call_operand.vmem [shape: bf16[8,768], index: 0, kind: input, shape index: {}]   ;;  %s416_s1 = inlined_call_operand.vmem [shape: bf16[2,1,2,32,128], index: 1, kind: input, shape index: {}, may-alias: {1,2}]   ;;  %s417_s2 = inlined_call_operand.vmem [shape: bf16[2,1,2,32,128], index: 2, kind: output, shape index: {}, may-alias: {1,2}]  }
   0x1   :  { %s374_s11 = smov 0   ;;  %s376_s12 = smov 0  }
   0x2   :  { %s378_s13 = smov 0  }
   0x3 LB: > { %s21_s1 = sadd.s32 1, %s345_s11  ;;  %s24_s14 = sadd.s32 1, %s349_s12  ;;  %s353_s13 = sphi %s378_s13, %s12_s13   ;;  %s349_s12 = sphi %s376_s12, %s421_s12   ;;  %s345_s11 = sphi %s374_s11, %s420_s11   ;;  %s341_s10 = sphi %s372_s10, %s419_s10   ;;  %s337_s9 = sphi %s370_s9, %s418_s9  }
   0x4   : > { %p22_p0 = scmp.ge.s32.totalorder %s21_s1, 2  ;;  %p260_p1 = scmp.ge.s32.totalorder %s353_s13, 1 }
   0x5   : > { %p113_p2 = scmp.lt.s32.totalorder %s353_s13, 5 }
   0x6   : > { %s423_s1 = smov (%p22_p0, %s21_s1), 0  ;;  %s425_s14 = smov (!%p22_p0, %s24_s14), %s349_s12 }
   0x7   : > { %p114_p3 = pnand %p260_p1, %p113_p2  ;;  %p26_p4 = scmp.ge.s32.totalorder %s425_s14, 2 }
   0x8   : > { %s273_s15 = sshll.u32 (!%p114_p3), %s341_s10, 1  ;;  %p150_p5 = scmp.lt.s32.totalorder (!%p114_p3), %s341_s10, 1 }
   0x9   : > { %s427_s14 = smov (%p26_p4, %s425_s14), 0  ;;  %117 = sbr.rel (%p114_p3) target bundleno = 24 (0x18), region = 24 }
   0xa   : > { %s274_s16 = sadd.s32 (!%p114_p3), 2, %s273_s15  ;;  %p152_p6 = scmp.lt.s32.totalorder (!%p114_p3), %s337_s9, 1 }
   0xb   : > { %s142_s17 = sadd.s32 (!%p114_p3), %s337_s9, %s274_s16 }
   0xc   : > { %p143_p7 = scmp.lt.s32.totalorder (!%p114_p3), %s142_s17, 5 }
  0x10   : > { %s429_s10 = smov (!%p150_p5, %s341_s10), 1  ;;  %s431_s17 = smov (!%p143_p7, %s142_s17), 5 }
  0x11   : > { %s433_s9 = smov (!%p152_p6, %s337_s9), 1  ;;  %s262_s18 = sshll.u32 %s431_s17, 2 }
  0x12   : > { %s264_s19 = sshll.u32 %s429_s10, 3  ;;  %s146_s22 = scalar_lea.vmem %s415_s0, %s262_s18 }
  0x13   : > { %s263_s23 = sshll.u32 %s433_s9, 2  ;;  %v160_v0 = vld [vmem:[%s146_s22] sm:$0xf] }
  0x14   : > { %s207_s24 = sadd.s32 %s264_s19, %s263_s23 }
  0x15   : > { %s265_s25 = sshll.u32 %s207_s24, 2 }
  0x16   : > { %s209_s28 = scalar_lea.vmem %s417_s2, %s265_s25 }
  0x17   : > { %266 = vst [vmem:[%s209_s28 + $0x4] sm:$0xf] %v160_v0 }
  0x18 PF: > { %s12_s13 = sadd.s32 1, %s353_s13   ;;  %s418_s9 = smov %s345_s11 }
  0x19   : > { %p9_p8 = scmp.ge.s32.totalorder %s12_s13, 6   ;;  %s419_s10 = smov %s349_s12 }
  0x1a   : > { %s420_s11 = smov %s423_s1  ;;  %s421_s12 = smov %s427_s14 }
  0x1b   :  { %11 = sbr.rel (!%p9_p8) target bundleno = 3 (0x3), region = 54 }

// kernel: baichuan2_block_forward.5
= control target key start
LH: loop header
LB: loop body
LE: loop exit
PB: predicated region body
PF: predicated region fallthrough
CT: control target
= control target key end

     0   :  { %8 = vsyncpa [#allocation5], 0  ;;  %s1016_s0 = inlined_call_operand.vmem [shape: bf16[8,256], index: 0, kind: input, shape index: {}]   ;;  %s1017_s1 = inlined_call_operand.vmem [shape: f32[1,256], index: 1, kind: input, shape index: {}]   ;;  %s1018_s2 = inlined_call_operand.hbm [shape: bf16[256,768], index: 2, kind: input, shape index: {}]   ;;  %s1019_s3 = inlined_call_operand.vmem [shape: bf16[8,768], index: 3, kind: output, shape index: {}]  }
   0x1   :  { %10 = vsyncpa [#allocation5 + $0x1], 0  ;;  %s837_s12 = smov 0   ;;  %s839_s13 = smov 0  }
   0x2   :  { %s841_s14 = smov 0   ;;  %s843_s15 = smov 0  }
   0x3   :  { %s845_s16 = smov 0   ;;  %s847_s17 = smov 0  }
   0x4   :  { %s849_s18 = smov 0   ;;  %s851_s19 = smov 0  }
   0x5 LB: > { %s570_s20 = sadd.s32 4294967295, %s809_s19   ;;  %s28_s21 = sadd.s32 1, %s801_s17  ;;  %s809_s19 = sphi %s851_s19, %s16_s19   ;;  %s805_s18 = sphi %s849_s18, %s1029_s18   ;;  %s801_s17 = sphi %s847_s17, %s1028_s17   ;;  %s797_s16 = sphi %s845_s16, %s1027_s16   ;;  %s793_s15 = sphi %s843_s15, %s1026_s15   ;;  %s789_s14 = sphi %s841_s14, %s1025_s14   ;;  %s785_s13 = sphi %s839_s13, %s1024_s13   ;;  %s781_s12 = sphi %s837_s12, %s1023_s12  }
   0x6   : > { %p29_p0 = scmp.ge.s32.totalorder %s28_s21, 2  ;;  %s31_s22 = sadd.s32 1, %s805_s18 }
   0x7   : > { %s91_s23 = sadd.s32 1, %s789_s14  ;;  %p98_p1 = scmp.ne.s32.totalorder %s789_s14, %s785_s13 }
   0x8   : > { %s1031_s21 = smov (%p29_p0, %s28_s21), 0  ;;  %s1033_s22 = smov (!%p29_p0, %s31_s22), %s805_s18 }
   0x9   : > { %s86_s24 = ssub.s32 %s801_s17, %s1031_s21  ;;  %p99_p2 = scmp.eq.s32.totalorder %s809_s19, 0 }
   0xa   : > { %p33_p3 = scmp.ge.s32.totalorder %s1033_s22, 3  ;;  %p104_p4 = scmp.ne.s32.totalorder %s785_s13, %s781_s12 }
   0xb   : > { %p888_p5 = por %p99_p2, %p98_p1  ;;  %p105_p6 = scmp.eq.s32.totalorder %s570_s20, 0 }
   0xc   : > { %s1035_s22 = smov (%p33_p3, %s1033_s22), 0  ;;  %p616_p8 = scmp.lt.s32.totalorder %s809_s19, 6 }
   0xd   : > { %p894_p7 = por %p105_p6, %p104_p4  ;;  %s87_s27 = ssub.s32 %s805_s18, %s1035_s22 }
   0xe   : > { %s88_s28 = sor.u32 %s87_s27, %s86_s24  ;;  %s167_s29 = sand.u32 1, %s789_s14  }
   0xf   : > { %p89_p9 = scmp.eq.s32.totalorder %s88_s28, 0  ;;  %s575_s30 = sshll.u32 %s167_s29, 7 }
  0x10   : > { %s577_s4 = sshll.u32 %s805_s18, 1  ;;  %s609_s6 = smul.u32 96, %s801_s17 }
  0x11   : > { %s904_s5 = scalar_select %p89_p9, %s789_s14, %s91_s23  }
  0x12   : > { %s171_s7 = scalar_lea.vmem [#allocation4], %s575_s30  ;;  %p909_p10 = pnand %p616_p8, %p888_p5 }
  0x13   : > { %s181_s8 = sshll.u32 %s171_s7, 4  ;;  %s178_s10 = sadd.s32 %s609_s6, %s577_s4  ;;  %s913_s8 = int_to_ptr.vmem [resolvable:$true] %s181_s8 }
  0x14   : > { %s579_s11 = sshll.u32 %s178_s10, 6  ;;  %s920_s23 = scalar_lea.sflag [#allocation5], %s167_s29 }
  0x15   : > { %s918_s24 = scalar_lea.hbm %s1018_s2, %s579_s11  ;;  %p715_p12 = pneg %p909_p10 }
  0x16   : > { %s713_s25 = scalar_lea.hbm %s918_s24, 2048  ;;  %s718_s30 = scalar_lea.hbm %s1018_s2, 12288 }
  0x17   : > { %p714_p11 = scmp.ne.s32.totalorder %s918_s24, %s713_s25  ;;  %p719_p1 = scmp.lt.u32.totalorder %s918_s24, %s1018_s2 }
  0x18   : > { %p720_p2 = scmp.lt.u32.totalorder %s718_s30, %s713_s25  ;;  %p722_p4 = scmp.lt.u32.totalorder %s713_s25, %s918_s24 }
  0x19   : > { %p716_p13 = pnand %p715_p12, %p714_p11 }
  0x1a   : > { %p721_p3 = por %p720_p2, %p719_p1 }
  0x1b   : > { %p717_p0 = pneg %p716_p13 }
  0x1c   : > { %p723_p5 = por %p722_p4, %p721_p3 }
  0x1e   : > { %p724_p6 = pnand %p723_p5, %p717_p0 }
  0x20   : > { %727 = shalt.err (!%p724_p6)
}
  0x21   : > { %s728_s29 = scalar_lea.vmem %s913_s8, 2048  ;;  %s811_s7 = smov [#allocation4]  }
  0x22   : > { %p729_p8 = scmp.ne.s32.totalorder %s913_s8, %s728_s29  ;;  %s733_s10 = sshll.u32 %s811_s7, 4  ;;  %s734_s10 = int_to_ptr.vmem [resolvable:$false] %s733_s10 }
  0x23   : > { %s735_s11 = scalar_lea.vmem %s734_s10, 4096  ;;  %p736_p13 = scmp.lt.s32.totalorder %s913_s8, %s734_s10 }
  0x24   : > { %p731_p9 = pnand %p729_p8, %p715_p12  ;;  %p737_p1 = scmp.lt.s32.totalorder %s735_s11, %s728_s29 }
  0x26   : > { %p732_p11 = pneg %p731_p9  ;;  %p738_p2 = por %p737_p1, %p736_p13 }
  0x28   : > { %p739_p3 = pnand %p738_p2, %p732_p11 }
  0x2a   : > { %742 = shalt.err (!%p739_p3)
}
  0x2b   : > { %s812_s12 = smov 384   ;;  %s813_s20 = smov 128  }
  0x2c   : > { %s814_s25 = smov 8   ;;  %p580_p12 = scmp.ge.s32.totalorder %s809_s19, 1 }
  0x2d   : > { %615 = dma.hbm_to_vmem [thread:$0]  (!%p909_p10), %s918_s24, 2048, %s913_s8, %s920_s23, %s812_s12, %s813_s20, %s814_s25  }
  0x2e   : > { %p189_p0 = scmp.lt.s32.totalorder %s809_s19, 7 }
  0x30   : > { %p190_p4 = pnand %p580_p12, %p189_p0 }
  0x31   : > { %s195_s27 = sand.u32 (!%p190_p4), 1, %s785_s13  }
  0x32   : > { %193 = sbr.rel (%p190_p4) target bundleno = 591 (0x24f), region = 32  ;;  %s581_s28 = sshll.u32 (!%p190_p4), %s195_s27, 7 }
  0x33   : > { %s196_s30 = scalar_lea.sflag (!%p190_p4), [#allocation5], %s195_s27  ;;  %s951_s4 = scalar_lea.vmem (!%p190_p4), [#allocation4], %s581_s28 }
  0x39   : > { %776 = dma.done.wait (%p894_p7), %s196_s30, 2048  }
  0x3a   : > { %778 = vsyncadd (%p894_p7), %s196_s30, 4294965248  ;;  %s582_s6 = sshll.u32 %s797_s16, 1  ;;  %p584_p10 = scmp.ne.s32.totalorder %s793_s15, 0 }
  0x3b   : > { %p241_p5 = scmp.lt.s32.totalorder %s582_s6, 5  ;;  %v255_v0 = vld [vmem:[%s1016_s0] sm:$0xff] (!%p584_p10)  ;;  %v815_v1 = vmov (!%p584_p10), 0.0   ;;  %vm267_vm0 = vcmask (!%p584_p10), 7168  }
  0x3c   : > { %252 = sbr.rel (%p584_p10) target bundleno = 224 (0xe0), region = 40  ;;  %253 = vst [vmem:[#allocation2] sm:$0xff] (!%p584_p10), %v815_v1  ;;  %254 = vst [vmem:[#allocation2 + $0x8] sm:$0xff] (!%p584_p10), %v815_v1  ;;  %v256_v2 = vunpack.c.l.bf16 (!%p584_p10), %v255_v0  ;;  %v257_v3 = vunpack.c.h.bf16 (!%p584_p10), %v255_v0 }
  0x3d   : > { %s1037_s6 = smov (!%p241_p5, %s582_s6), 5 }
  0x3e   : > { %s583_s8 = sshll.u32 %s1037_s6, 2  ;;  %v258_v4 = vmul.f32 (!%p584_p10), %v256_v2, %v256_v2  ;;  %v259_v5 = vmul.f32 (!%p584_p10), %v257_v3, %v257_v3 }
  0x3f   : > { %s961_s23 = scalar_lea.vmem %s1019_s3, %s583_s8 }
  0x40   : > { %v260_v6 = vadd.f32 (!%p584_p10), %v259_v5, %v258_v4 }
  0x42   : > { %261 = vadd.xlane.f32.xlu0 (!%p584_p10), %v260_v6 }
  0xcf   : > { %v262_v7 = vpop.xlane.xlu0 %261 }
  0xd0   : > { %v264_v8 = vmul.f32 0.00390625, %v262_v7 }
  0xd2   : > { %v265_v9 = vadd.f32 1e-06, %v264_v8 }
  0xd4   : > { %686 = vrsqrt.f32 %v265_v9 }
  0xde   : > { %v687_v10 = vpop.eup %686 }
  0xdf   : > { %268 = vst.msk [vmem:[#allocation3] sm:$0xff] %vm267_vm0, %v687_v10 }
  0xe0 PF: > { %v816_v12 = vmov 0   ;;  %v689_v13 = vld [vmem:[%s951_s4 + $0x4] ss:$8 sps:$4 sm:$0xff]   ;;  %v691_v14 = vld [vmem:[%s951_s4] ss:$8 sps:$4 sm:$0xff]   ;;  %s585_s16 = sshll.u32 %s793_s15, 7 }
  0xe1   : > { %688 = vset.pattern.permute.xlu0 %v816_v12  ;;  %423 = vmatprep.mubr.bf16.mxu0 %v816_v12  ;;  %v692_v15 = vld [vmem:[%s951_s4 + $0x14] ss:$8 sps:$4 sm:$0xff]   ;;  %v694_v16 = vld [vmem:[%s951_s4 + $0x10] ss:$8 sps:$4 sm:$0xff]   ;;  %v695_v17 = vld [vmem:[%s951_s4 + $0x24] ss:$8 sps:$4 sm:$0xff]  }
  0xe2   : > { %391 = vmatprep.subr.bf16.mxu0 %v689_v13  ;;  %v697_v18 = vld [vmem:[%s951_s4 + $0x20] ss:$8 sps:$4 sm:$0xff]   ;;  %v698_v19 = vld [vmem:[%s951_s4 + $0x34] ss:$8 sps:$4 sm:$0xff]   ;;  %v700_v20 = vld [vmem:[%s951_s4 + $0x30] ss:$8 sps:$4 sm:$0xff]  }
  0xe3   : > { %392 = vmatpush1.bf16.msra.mxu0 %v691_v14  ;;  %v701_v21 = vld [vmem:[%s951_s4 + $0x44] ss:$8 sps:$4 sm:$0xff]   ;;  %v703_v22 = vld [vmem:[%s951_s4 + $0x40] ss:$8 sps:$4 sm:$0xff]   ;;  %v704_v23 = vld [vmem:[%s951_s4 + $0x54] ss:$8 sps:$4 sm:$0xff]  }
  0xe4   : > { %393 = vmatprep.subr.bf16.mxu0 %v692_v15  ;;  %v706_v24 = vld [vmem:[%s951_s4 + $0x50] ss:$8 sps:$4 sm:$0xff]   ;;  %v707_v25 = vld [vmem:[%s951_s4 + $0x64] ss:$8 sps:$4 sm:$0xff]   ;;  %v709_v26 = vld [vmem:[%s951_s4 + $0x60] ss:$8 sps:$4 sm:$0xff]  }
  0xe5   : > { %v710_v27 = vld [vmem:[%s951_s4 + $0x74] ss:$8 sps:$4 sm:$0xff]   ;;  %v712_v28 = vld [vmem:[%s951_s4 + $0x70] ss:$8 sps:$4 sm:$0xff]   ;;  %s270_s26 = sshra.s32 %s585_s16, 7  ;;  %v293_v36 = vld [vmem:[#allocation2] sm:$0xff] }
  0xe6   : > { %v278_v11 = vld [vmem:[#allocation3] sm:$0xff]  ;;  %s586_s10 = sshll.u32 %s270_s26, 2  ;;  %s276_s28 = scalar_lea.vmem %s1017_s1, %s270_s26  ;;  %v294_v37 = vld [vmem:[#allocation2 + $0x8] sm:$0xff] }
  0xe7   : > { %281 = vperm.xlu0 %688, %v278_v11   ;;  %394 = vmatpush1.bf16.msra.mxu0 %v694_v16  ;;  %s273_s20 = scalar_lea.vmem %s1016_s0, %s586_s10  ;;  %v587_v32 = vld [vmem:[%s276_s28] ss:$0 sm:$0xff]  ;;  %p604_p7 = scmp.ne.s32.totalorder %s793_s15, 1 }
  0xe8   : > { %395 = vmatprep.subr.bf16.mxu0 %v695_v17  ;;  %v274_v29 = vld [vmem:[%s273_s20] sm:$0xf] }
  0xe9   : > { %v275_v30 = vunpack.c.l.bf16 %v274_v29 }
  0xeb   : > { %396 = vmatpush1.bf16.msra.mxu0 %v697_v18 }
  0xec   : > { %397 = vmatprep.subr.bf16.mxu0 %v698_v19 }
  0xef   : > { %398 = vmatpush1.bf16.msra.mxu0 %v700_v20 }
  0xf0   : > { %399 = vmatprep.subr.bf16.mxu0 %v701_v21 }
  0xf3   : > { %400 = vmatpush1.bf16.msra.mxu0 %v703_v22 }
  0xf4   : > { %401 = vmatprep.subr.bf16.mxu0 %v704_v23 }
  0xf7   : > { %402 = vmatpush1.bf16.msra.mxu0 %v706_v24 }
  0xf8   : > { %403 = vmatprep.subr.bf16.mxu0 %v707_v25 }
  0xfb   : > { %404 = vmatpush1.bf16.msra.mxu0 %v709_v26 }
  0xfc   : > { %405 = vmatprep.subr.bf16.mxu0 %v710_v27 }
  0xff   : > { %406 = vmatpush1.bf16.msra.mxu0 %v712_v28 }
 0x166   : > { %v282_v31 = vpop.permute.xlu0 %281 }
 0x167   : > { %v284_v33 = vmul.f32 %v282_v31, %v275_v30 }
 0x169   : > { %v291_v34 = vmul.f32 %v587_v32, %v284_v33 }
 0x16b   : > { %v292_v35 = vpack.c.bf16 %v291_v34, %v291_v34 }
 0x16d   : > { %424 = vmatmul.mubr.bf16.vlgmr.msra.gmra.mrb[0].mxu0 %v292_v35 }
 0x23e   : > { %439 = sbr.rel (%p604_p7) target bundleno = 591 (0x24f), region = 44 }
 0x240   : > { %v425_v38 = vpop.f32.mrb[0].mxu0 }
 0x241   : > { %v432_v39 = vadd.f32 %v425_v38, %v293_v36  ;;  %v427_v40 = vpop.f32.mrb[1].mxu0 }
 0x242   : > { %v433_v41 = vadd.f32 %v427_v40, %v294_v37  ;;  %v429_v42 = vpop.f32.mrb[2].mxu0 }
 0x243   : > { %434 = vst [vmem:[#allocation2] sm:$0xff] %v432_v39  ;;  %v430_v43 = vpop.f32.mrb[3].mxu0 }
 0x244   : > { %435 = vst [vmem:[#allocation2 + $0x8] sm:$0xff] %v433_v41 }
 0x24a   : > { %v440_v44 = vld [vmem:[#allocation2] sm:$0xff] }
 0x24b   : > { %v441_v45 = vld [vmem:[#allocation2 + $0x8] sm:$0xff] }
 0x24c   : > { %v608_v46 = vpack.c.bf16 %v441_v45, %v440_v44 }
 0x24e   : > { %450 = vst [vmem:[%s961_s23] sm:$0xff] %v608_v46 }
 0x24f PF: > { %s16_s19 = sadd.s32 1, %s809_s19   ;;  %s1023_s12 = smov %s785_s13 }
 0x250   : > { %p13_p6 = scmp.ge.s32.totalorder %s16_s19, 8   ;;  %s1024_s13 = smov %s789_s14 }
 0x251   : > { %s1025_s14 = smov %s904_s5  ;;  %s1026_s15 = smov %s801_s17 }
 0x252   : > { %s1027_s16 = smov %s805_s18  ;;  %s1028_s17 = smov %s1031_s21 }
 0x253   : > { %s1029_s18 = smov %s1035_s22  ;;  %15 = sbr.rel (!%p13_p6) target bundleno = 5 (0x5), region = 85 }
 0x25a   :  { %481 = vsyncpa [#allocation5], 1 }
 0x25b   :  { %483 = vsyncpa [#allocation5 + $0x1], 1 }

// kernel: baichuan2_block_forward.7
= control target key start
LH: loop header
LB: loop body
LE: loop exit
PB: predicated region body
PF: predicated region fallthrough
CT: control target
= control target key end

     0   :  { %s977_s12 = smov 0   ;;  %s979_s13 = smov 0   ;;  %s1077_s0 = inlined_call_operand.vmem [shape: bf16[2,8,128], index: 0, kind: input, shape index: {}]   ;;  %s1078_s1 = inlined_call_operand.vmem [shape: f32[2,1], index: 1, kind: input, shape index: {}]   ;;  %s1079_s2 = inlined_call_operand.vmem [shape: bf16[2,1,2,32,128], index: 2, kind: input, shape index: {}]   ;;  %s1080_s3 = inlined_call_operand.vmem [shape: bf16[2,8,128], index: 3, kind: output, shape index: {}]  }
   0x1   :  { %s981_s14 = smov 0   ;;  %s983_s15 = smov 0  }
   0x2   :  { %s985_s16 = smov 0  }
   0x3 LB: > { %s25_s17 = sadd.s32 1, %s944_s15  ;;  %p102_p1 = scmp.ne.s32.totalorder %s936_s13, %s932_s12  ;;  %s948_s16 = sphi %s985_s16, %s13_s16   ;;  %s944_s15 = sphi %s983_s15, %s1084_s15   ;;  %s940_s14 = sphi %s981_s14, %s1083_s14   ;;  %s936_s13 = sphi %s979_s13, %s1082_s13   ;;  %s932_s12 = sphi %s977_s12, %s1081_s12  }
   0x4   : > { %p26_p0 = scmp.ge.s32.totalorder %s25_s17, 4  ;;  %p103_p2 = scmp.eq.s32.totalorder %s948_s16, 0 }
   0x5   : > { %s95_s19 = sadd.s32 1, %s936_s13  ;;  %p793_p5 = scmp.ge.s32.totalorder %s948_s16, 4 }
   0x6   : > { %s1086_s17 = smov (%p26_p0, %s25_s17), 0  ;;  %p104_p3 = por %p103_p2, %p102_p1 }
   0x7   : > { %s91_s18 = ssub.s32 %s944_s15, %s1086_s17  ;;  %175 = sbr.rel (%p793_p5) target bundleno = 21 (0x15), region = 24 }
   0x8   : > { %p93_p4 = scmp.eq.s32.totalorder %s91_s18, 0 }
   0xa   : > { %s1012_s20 = scalar_select %p93_p4, %s936_s13, %s95_s19  }
   0xe   : > { %178 = sbr.rel (!%p104_p3) target bundleno = 21 (0x15), region = 28  ;;  %s180_s21 = sand.u32 (%p104_p3), 1, %s936_s13  }
   0xf   : > { %s795_s22 = sshll.u32 (%p104_p3), %s944_s15, 2  ;;  %s794_s23 = sshll.u32 (%p104_p3), %s180_s21, 4 }
  0x10   : > { %s187_s26 = scalar_lea.vmem (%p104_p3), %s1079_s2, %s795_s22  ;;  %s182_s27 = scalar_lea.vmem (%p104_p3), [#allocation5], %s794_s23 }
  0x11   : > { %v203_v0 = vld [vmem:[%s187_s26] sm:$0xf] (%p104_p3)  ;;  %v205_v1 = vld [vmem:[%s187_s26 + $0x10] sm:$0xf] (%p104_p3) }
  0x12   : > { %204 = vst [vmem:[%s182_s27] sm:$0xf] (%p104_p3), %v203_v0  ;;  %206 = vst [vmem:[%s182_s27 + $0x4] sm:$0xf] (%p104_p3), %v205_v1  ;;  %v207_v2 = vld [vmem:[%s187_s26 + $0x20] sm:$0xf] (%p104_p3) }
  0x13   : > { %v209_v3 = vld [vmem:[%s187_s26 + $0x30] sm:$0xf] (%p104_p3)  ;;  %208 = vst [vmem:[%s182_s27 + $0x8] sm:$0xf] (%p104_p3), %v207_v2 }
  0x14   : > { %210 = vst [vmem:[%s182_s27 + $0xc] sm:$0xf] (%p104_p3), %v209_v3 }
  0x15 PF: > { %p796_p6 = scmp.ge.s32.totalorder %s948_s16, 1  ;;  %p240_p7 = scmp.lt.s32.totalorder %s948_s16, 5 }
  0x17   : > { %p241_p8 = pnand %p796_p6, %p240_p7 }
  0x18   : > { %s247_s28 = sand.u32 (!%p241_p8), 1, %s932_s12   ;;  %p798_p9 = scmp.ne.s32.totalorder (!%p241_p8), %s940_s14, 0 }
  0x19   : > { %244 = sbr.rel (%p241_p8) target bundleno = 925 (0x39d), region = 69  ;;  %s797_s29 = sshll.u32 (!%p241_p8), %s247_s28, 4 }
  0x1a   : > { %s1023_s30 = scalar_lea.vmem (!%p241_p8), [#allocation5], %s797_s29 }
  0x20   : > { %312 = sbr.rel (%p798_p9) target bundleno = 39 (0x27), region = 77  ;;  %vm313_vm0 = vcmask (!%p798_p9), 7168   ;;  %v950_v4 = vmov (!%p798_p9), -1e+30   ;;  %v951_v5 = vmov (!%p798_p9), 0.0  }
  0x21   : > { %314 = vst.msk [vmem:[#allocation2] sm:$0xff] (!%p798_p9), %vm313_vm0, %v950_v4  ;;  %315 = vst.msk [vmem:[#allocation2 + $0x8] sm:$0xff] (!%p798_p9), %vm313_vm0, %v950_v4 }
  0x22   : > { %316 = vst.msk [vmem:[#allocation3] sm:$0xff] (!%p798_p9), %vm313_vm0, %v951_v5  ;;  %317 = vst.msk [vmem:[#allocation3 + $0x8] sm:$0xff] (!%p798_p9), %vm313_vm0, %v951_v5 }
  0x23   : > { %318 = vst [vmem:[#allocation4] sm:$0xff] (!%p798_p9), %v951_v5  ;;  %319 = vst [vmem:[#allocation4 + $0x8] sm:$0xff] (!%p798_p9), %v951_v5 }
  0x27 PF: > { %s799_s4 = sshll.u32 %s940_s14, 3 }
  0x28   : > { %p800_p10 = scmp.gt.s32.totalorder %s799_s4, 15 }
  0x29   : > { %v330_v6 = vld [vmem:[%s1023_s30] sm:$0xf] (!%p800_p10)  ;;  %v331_v7 = vld [vmem:[%s1023_s30 + $0x4] sm:$0xf] (!%p800_p10)  ;;  %v417_v8 = vlaneseq (!%p800_p10)  ;;  %v952_v9 = vmov (!%p800_p10), 0.0   ;;  %vm953_vm1 = vmmov (!%p800_p10), 0   ;;  %v425_v24 = vstv (!%p800_p10), %s799_s4 }
  0x2a   : > { %327 = sbr.rel (%p800_p10) target bundleno = 775 (0x307), region = 81  ;;  %824 = vmatprep.subr.bf16.mxu0 (!%p800_p10), %v952_v9  ;;  %830 = vmatprep.subr.bf16.mxu1 (!%p800_p10), %v952_v9  ;;  %v954_v10 = vmov (!%p800_p10), 0   ;;  %v955_v12 = vmov (!%p800_p10), 1966171168   ;;  %v328_v15 = vld [vmem:[%s1077_s0] sm:$0xf] (!%p800_p10) }
  0x2b   : > { %825 = vmatpush3.bf16.xpose.msra.mxu0 (!%p800_p10), %v330_v6  ;;  %831 = vmatpush3.bf16.xpose.msra.mxu1 (!%p800_p10), %v331_v7  ;;  %v418_v11 = vshrl.u32 (!%p800_p10), %v417_v8, 7  ;;  %v438_v13 = vunpack.c.l.s4 (!%p800_p10), %v955_v12  ;;  %v803_v14 = vld.sshfl [vmem:[%s1078_s1] sm:$0x11 pattern:$0x75316420] (!%p800_p10)  ;;  %v420_v20 = vand.u32 (!%p800_p10), 127, %v417_v8 }
  0x2c   : > { %826 = vmatprep.mubr.msk.bf16.mxu0 (!%p800_p10), %vm953_vm1, %v952_v9  ;;  %832 = vmatprep.mubr.msk.bf16.mxu1 (!%p800_p10), %vm953_vm1, %v952_v9  ;;  %v329_v16 = vld [vmem:[%s1077_s0 + $0x4] sm:$0xf] (!%p800_p10)  ;;  %v436_v17 = vcombine.high (!%p800_p10), %v803_v14, %v803_v14  ;;  %vm486_vm3 = vcmask (!%p800_p10), 64512   ;;  %vm529_vm4 = vcmask (!%p800_p10), 7168   ;;  %v485_v56 = vld [vmem:[#allocation2 + $0x8] sm:$0xff] (!%p800_p10)  ;;  %vm551_vm5 = vcmask (!%p800_p10), 1043456  }
  0x2d   : > { %895 = vset.pattern.permute.xlu0 (!%p800_p10), %v954_v10  ;;  %896 = vset.pattern.permute.xlu1 (!%p800_p10), %v954_v10  ;;  %v439_v18 = vunpack.c.0.s8 (!%p800_p10), %v438_v13  ;;  %v461_v22 = vsub.s32 (!%p800_p10), 0, %v418_v11  ;;  %v426_v27 = vadd.s32 (!%p800_p10), %v425_v24, %v420_v20  ;;  %v424_v29 = vadd.s32 (!%p800_p10), 8, %v418_v11  ;;  %v484_v53 = vld [vmem:[#allocation2] sm:$0xff] (!%p800_p10)  ;;  %v801_v61 = vld [vmem:[%s1023_s30 + $0x8] sm:$0xf] (!%p800_p10) }
  0x2e   : > { %836 = vmatprep.subr.bf16.mxu0 (!%p800_p10), %v952_v9  ;;  %842 = vmatprep.subr.bf16.mxu1 (!%p800_p10), %v952_v9  ;;  %v802_v62 = vld [vmem:[%s1023_s30 + $0xc] sm:$0xf] (!%p800_p10)  ;;  %v553_v63 = vsel (!%p800_p10), %vm551_vm5, %v801_v61, 0 }
  0x2f   : > { %v442_v19 = vsub.s32 (!%p800_p10), %v439_v18, %v418_v11  ;;  %v455_v31 = vsub.s32 (!%p800_p10), %v424_v29, %v426_v27  ;;  %vm477_vm2 = vcmp.le.s32.totalorder (!%p800_p10), %v426_v27, %v424_v29  ;;  %v599_v0 = vsel (!%p800_p10), %vm551_vm5, %v802_v62, 0  ;;  %v518_v20 = vld [vmem:[#allocation3 + $0x8] sm:$0xff] (!%p800_p10) }
  0x31   : > { %v443_v21 = vrot.slane %v803_v14, %v442_v19  ;;  %v450_v23 = vrot.slane %v436_v17, %v442_v19  ;;  %v456_v32 = vcvt.s32.f32 %v455_v31  ;;  %v517_v17 = vld [vmem:[#allocation3] sm:$0xff] }
  0x32   : > { %827 = vmatmul.mubr.bf16.vlgmr.msra.gmra.mrb[0].mxu0 %v328_v15  ;;  %833 = vmatmul.mubr.bf16.vlgmr.msra.gmra.mrb[0].mxu1 %v329_v16 }
  0x33   : > { %838 = vmatprep.mubr.msk.bf16.mxu0 %vm953_vm1, %v952_v9  ;;  %844 = vmatprep.mubr.msk.bf16.mxu1 %vm953_vm1, %v952_v9  ;;  %v453_v25 = vsub.f32 0.0, %v443_v21  ;;  %v454_v26 = vsub.f32 0.0, %v450_v23 }
  0x34   : > { %837 = vmatpush3.bf16.msra.mxu0 %v553_v63  ;;  %843 = vmatpush3.bf16.msra.mxu1 %v599_v0 }
  0x35   : > { %v462_v28 = vrot.slane %v453_v25, %v461_v22  ;;  %v466_v30 = vrot.slane %v454_v26, %v461_v22  ;;  %v532_v25 = vld [vmem:[#allocation4] sm:$0xff] }
  0x37   : > { %468 = vperm.xlu0 %895, %v462_v28   ;;  %v533_v28 = vld [vmem:[#allocation4 + $0x8] sm:$0xff] }
  0x3b   : > { %472 = vperm.xlu0 %895, %v466_v30  }
  0xb6   : > { %v469_v33 = vpop.permute.xlu0 %468 }
  0xb7   : > { %v475_v34 = vmul.f32 %v469_v33, %v456_v32 }
  0xb9   : > { %v480_v35 = vsel %vm477_vm2, %v475_v34, -1e+09 }
  0xba   : > { %v473_v36 = vpop.permute.xlu0 %472 }
  0xbb   : > { %v476_v37 = vmul.f32 %v473_v36, %v456_v32 }
  0xbd   : > { %v481_v38 = vsel %vm477_vm2, %v476_v37, -1e+09 }
 0x105   : > { %v369_v39 = vpop.f32.mrb[0].mxu0  ;;  %v409_v40 = vpop.f32.mrb[0].mxu1 }
 0x106   : > { %v415_v41 = vmul.f32 0.088388346, %v369_v39  ;;  %v416_v42 = vmul.f32 0.088388346, %v409_v40  ;;  %v828_v43 = vpop.f32.mrb[1].mxu0  ;;  %v834_v44 = vpop.f32.mrb[1].mxu1 }
 0x107   : > { %v372_v45 = vpop.f32.mrb[2].mxu0  ;;  %v412_v46 = vpop.f32.mrb[2].mxu1 }
 0x108   : > { %v829_v47 = vpop.f32.mrb[3].mxu0  ;;  %v835_v48 = vpop.f32.mrb[3].mxu1  ;;  %v482_v49 = vadd.f32 %v480_v35, %v415_v41  ;;  %v483_v50 = vadd.f32 %v481_v38, %v416_v42 }
 0x10a   : > { %v487_v51 = vsel %vm486_vm3, %v482_v49, -inf  ;;  %v490_v52 = vsel %vm486_vm3, %v483_v50, -inf }
 0x10b   : > { %488 = vmax.xlane.f32.xlu1 %v487_v51 }
 0x10f   : > { %491 = vmax.xlane.f32.xlu1 %v490_v52 }
 0x198   : > { %v489_v54 = vpop.xlane.xlu1 %488 }
 0x199   : > { %v493_v55 = vmax.f32 %v484_v53, %v489_v54 }
 0x19b   : > { %v495_v57 = vsub.f32 %v484_v53, %v493_v55  ;;  %645 = vst.msk [vmem:[#allocation2] sm:$0xff] %vm529_vm4, %v493_v55  ;;  %503 = vperm.xlu0 %895, %v493_v55  }
 0x19c   : > { %v492_v58 = vpop.xlane.xlu1 %491 }
 0x19d   : > { %v494_v59 = vmax.f32 %v485_v56, %v492_v58  ;;  %v497_v14 = vmul.f32 1.442695, %v495_v57 }
 0x19f   : > { %v496_v60 = vsub.f32 %v485_v56, %v494_v59  ;;  %646 = vst.msk [vmem:[#allocation2 + $0x8] sm:$0xff] %vm529_vm4, %v494_v59  ;;  %508 = vperm.xlu1 %896, %v494_v59  }
 0x1a1   : > { %v499_v13 = vmul.f32 1.442695, %v496_v60 }
 0x21a   : > { %v504_v1 = vpop.permute.xlu0 %503 }
 0x21b   : > { %v511_v2 = vsub.f32 %v482_v49, %v504_v1 }
 0x21d   : > { %v513_v3 = vmul.f32 1.442695, %v511_v2 }
 0x21e   : > { %v509_v4 = vpop.permute.xlu1 %508 }
 0x21f   : > { %897 = vpow2.f32 %v513_v3  ;;  %v512_v5 = vsub.f32 %v483_v50, %v509_v4 }
 0x221   : > { %v515_v6 = vmul.f32 1.442695, %v512_v5 }
 0x223   : > { %899 = vpow2.f32 %v515_v6 }
 0x224   : > { %901 = vpow2.f32 %v499_v13 }
 0x225   : > { %903 = vpow2.f32 %v497_v14 }
 0x229   : > { %v898_v7 = vpop.eup %897 }
 0x22a   : > { %v521_v8 = vsel %vm486_vm3, %v898_v7, 0.0  ;;  %v546_v9 = vpack.c.bf16 %v898_v7, %v898_v7 }
 0x22b   : > { %522 = vadd.xlane.f32.xlu0 %v521_v8 }
 0x22c   : > { %839 = vmatmul.mubr.msk.bf16.vlgmr.msra.gmra.mrb[4].mxu0 %vm486_vm3, %v546_v9 }
 0x22d   : > { %v900_v10 = vpop.eup %899 }
 0x22e   : > { %v524_v11 = vsel %vm486_vm3, %v900_v10, 0.0  ;;  %v547_v12 = vpack.c.bf16 %v900_v10, %v900_v10  ;;  %v902_v15 = vpop.eup %901 }
 0x22f   : > { %525 = vadd.xlane.f32.xlu1 %v524_v11  ;;  %v904_v16 = vpop.eup %903  ;;  %v520_v22 = vmul.f32 %v902_v15, %v518_v20 }
 0x230   : > { %845 = vmatmul.mubr.msk.bf16.vlgmr.msra.gmra.mrb[4].mxu1 %vm486_vm3, %v547_v12  ;;  %v519_v18 = vmul.f32 %v904_v16, %v517_v17 }
 0x240   : > { %541 = vperm.xlu1 %896, %v902_v15  }
 0x241   : > { %536 = vperm.xlu0 %895, %v904_v16  }
 0x2b8   : > { %v523_v19 = vpop.xlane.xlu0 %522 }
 0x2b9   : > { %v527_v21 = vadd.f32 %v523_v19, %v519_v18 }
 0x2bb   : > { %530 = vst.msk [vmem:[#allocation3] sm:$0xff] %vm529_vm4, %v527_v21 }
 0x2bc   : > { %v526_v23 = vpop.xlane.xlu1 %525 }
 0x2bd   : > { %v528_v24 = vadd.f32 %v526_v23, %v520_v22 }
 0x2bf   : > { %531 = vst.msk [vmem:[#allocation3 + $0x8] sm:$0xff] %vm529_vm4, %v528_v24 }
 0x2c0   : > { %v537_v26 = vpop.permute.xlu0 %536  ;;  %v542_v29 = vpop.permute.xlu1 %541 }
 0x2c1   : > { %v544_v27 = vmul.f32 %v537_v26, %v532_v25  ;;  %v545_v34 = vmul.f32 %v542_v29, %v533_v28 }
 0x2ff   : > { %v589_v30 = vpop.f32.mrb[4].mxu0 }
 0x300   : > { %v641_v31 = vadd.f32 %v589_v30, %v544_v27  ;;  %v840_v32 = vpop.f32.mrb[5].mxu0 }
 0x301   : > { %v592_v33 = vpop.f32.mrb[6].mxu0 }
 0x302   : > { %643 = vst [vmem:[#allocation4] sm:$0xff] %v641_v31  ;;  %v841_v35 = vpop.f32.mrb[7].mxu0 }
 0x303   : > { %v635_v36 = vpop.f32.mrb[4].mxu1 }
 0x304   : > { %v642_v37 = vadd.f32 %v635_v36, %v545_v34  ;;  %v846_v38 = vpop.f32.mrb[5].mxu1 }
 0x305   : > { %v638_v39 = vpop.f32.mrb[6].mxu1 }
 0x306   : > { %644 = vst [vmem:[#allocation4 + $0x8] sm:$0xff] %v642_v37  ;;  %v847_v40 = vpop.f32.mrb[7].mxu1 }
 0x307 PF: > { %p806_p11 = scmp.ne.s32.totalorder %s940_s14, 3 }
 0x308   : > { %v653_v41 = vld [vmem:[#allocation3] sm:$0xff] (!%p806_p11)  ;;  %v654_v42 = vld [vmem:[#allocation3 + $0x8] sm:$0xff] (!%p806_p11)  ;;  %v956_v43 = vmov (!%p806_p11), 0  }
 0x309   : > { %650 = sbr.rel (%p806_p11) target bundleno = 925 (0x39d), region = 85  ;;  %905 = vset.pattern.permute.xlu0 (!%p806_p11), %v956_v43  ;;  %906 = vrcp.f32 (!%p806_p11), %v653_v41  ;;  %v651_v47 = vld [vmem:[#allocation4] sm:$0xff] (!%p806_p11) }
 0x30a   : > { %908 = vrcp.f32 (!%p806_p11), %v654_v42 }
 0x30d   : > { %v652_v48 = vld [vmem:[#allocation4 + $0x8] sm:$0xff] (!%p806_p11) }
 0x313   : > { %v907_v44 = vpop.eup %906 }
 0x314   : > { %659 = vperm.xlu0 %905, %v907_v44   ;;  %v909_v45 = vpop.eup %908 }
 0x318   : > { %664 = vperm.xlu0 %905, %v909_v45  }
 0x393   : > { %v660_v46 = vpop.permute.xlu0 %659 }
 0x394   : > { %v667_v50 = vmul.f32 %v660_v46, %v651_v47 }
 0x397   : > { %v665_v49 = vpop.permute.xlu0 %664 }
 0x398   : > { %v668_v51 = vmul.f32 %v665_v49, %v652_v48 }
 0x39a   : > { %v814_v52 = vpack.c.bf16 %v668_v51, %v667_v50 }
 0x39c   : > { %815 = vst [vmem:[%s1080_s3] sm:$0xff] %v814_v52  }
 0x39d PF: > { %s13_s16 = sadd.s32 1, %s948_s16   ;;  %s1081_s12 = smov %s936_s13 }
 0x39e   : > { %p10_p12 = scmp.ge.s32.totalorder %s13_s16, 6   ;;  %s1082_s13 = smov %s1012_s20 }
 0x39f   : > { %s1083_s14 = smov %s944_s15  ;;  %s1084_s15 = smov %s1086_s17 }
 0x3a0   :  { %12 = sbr.rel (!%p10_p12) target bundleno = 3 (0x3), region = 127 }

// kernel: baichuan2_block_forward.8
= control target key start
LH: loop header
LB: loop body
LE: loop exit
PB: predicated region body
PF: predicated region fallthrough
CT: control target
= control target key end

     0   :  { %s716_s12 = smov 0   ;;  %s718_s13 = smov 0   ;;  %s783_s0 = inlined_call_operand.vmem [shape: bf16[8,256], index: 0, kind: input, shape index: {}]   ;;  %s784_s1 = inlined_call_operand.vmem [shape: bf16[256,256], index: 1, kind: input, shape index: {}]   ;;  %s785_s2 = inlined_call_operand.vmem [shape: bf16[8,256], index: 2, kind: input, shape index: {}]   ;;  %s786_s3 = inlined_call_operand.vmem [shape: bf16[8,256], index: 3, kind: output, shape index: {}]  }
   0x1   :  { %s720_s14 = smov 0  }
   0x2 LB: > { %s25_s15 = sadd.s32 1, %s688_s13  ;;  %p590_p0 = scmp.ge.s32.totalorder %s692_s14, 1  ;;  %s692_s14 = sphi %s720_s14, %s13_s14   ;;  %s688_s13 = sphi %s718_s13, %s788_s13   ;;  %s684_s12 = sphi %s716_s12, %s787_s12  }
   0x3   : > { %p26_p1 = scmp.ge.s32.totalorder %s25_s15, 2  ;;  %p199_p2 = scmp.lt.s32.totalorder %s692_s14, 3 }
   0x5   : > { %s790_s15 = smov (%p26_p1, %s25_s15), 0  ;;  %p200_p3 = pnand %p590_p0, %p199_p2 }
   0x6   : > { %p251_p4 = scmp.lt.s32.totalorder (!%p200_p3), %s684_s12, 1  ;;  %s592_s16 = sshll.u32 (!%p200_p3), %s684_s12, 4 }
   0x7   : > { %203 = sbr.rel (%p200_p3) target bundleno = 283 (0x11b), region = 32  ;;  %p259_p5 = scmp.lt.s32.totalorder (!%p200_p3), %s592_s16, 31 }
   0x8   : > { %p595_p6 = scmp.ne.s32.totalorder (!%p200_p3), %s684_s12, 0 }
   0xe   : > { %s252_s17 = scalar_select %p251_p4, %s684_s12, 1 }
   0xf   : > { %s792_s16 = smov (!%p259_p5, %s592_s16), 31  ;;  %293 = sbr.rel (%p595_p6) target bundleno = 22 (0x16), region = 36 }
  0x10   : > { %s591_s18 = sshll.u32 %s252_s17, 2  ;;  %s618_s22 = sshll.u32 %s792_s16, 3  ;;  %v694_v0 = vmov (!%p595_p6), 0.0  }
  0x11   : > { %s742_s21 = scalar_lea.vmem %s783_s0, %s591_s18  ;;  %s747_s25 = scalar_lea.vmem %s784_s1, %s618_s22  ;;  %294 = vst [vmem:[#allocation2] sm:$0xff] (!%p595_p6), %v694_v0  ;;  %295 = vst [vmem:[#allocation2 + $0x8] sm:$0xff] (!%p595_p6), %v694_v0 }
  0x16 PF: > { %v646_v1 = vld [vmem:[%s747_s25 + $0x4] ss:$8 sps:$4 sm:$0xff]   ;;  %v648_v2 = vld [vmem:[%s747_s25] ss:$8 sps:$4 sm:$0xff]   ;;  %v695_v3 = vmov 0   ;;  %p612_p7 = scmp.ne.s32.totalorder %s684_s12, 1 }
  0x17   : > { %427 = vmatprep.mubr.bf16.mxu0 %v695_v3  ;;  %395 = vmatprep.subr.bf16.mxu0 %v646_v1  ;;  %v649_v4 = vld [vmem:[%s747_s25 + $0x14] ss:$8 sps:$4 sm:$0xff]   ;;  %v651_v5 = vld [vmem:[%s747_s25 + $0x10] ss:$8 sps:$4 sm:$0xff]   ;;  %v652_v6 = vld [vmem:[%s747_s25 + $0x24] ss:$8 sps:$4 sm:$0xff]  }
  0x18   : > { %396 = vmatpush1.bf16.msra.mxu0 %v648_v2  ;;  %v654_v7 = vld [vmem:[%s747_s25 + $0x20] ss:$8 sps:$4 sm:$0xff]   ;;  %v655_v8 = vld [vmem:[%s747_s25 + $0x34] ss:$8 sps:$4 sm:$0xff]   ;;  %v657_v9 = vld [vmem:[%s747_s25 + $0x30] ss:$8 sps:$4 sm:$0xff]  }
  0x19   : > { %397 = vmatprep.subr.bf16.mxu0 %v649_v4  ;;  %v658_v10 = vld [vmem:[%s747_s25 + $0x44] ss:$8 sps:$4 sm:$0xff]   ;;  %v660_v11 = vld [vmem:[%s747_s25 + $0x40] ss:$8 sps:$4 sm:$0xff]   ;;  %v661_v12 = vld [vmem:[%s747_s25 + $0x54] ss:$8 sps:$4 sm:$0xff]  }
  0x1a   : > { %v663_v13 = vld [vmem:[%s747_s25 + $0x50] ss:$8 sps:$4 sm:$0xff]   ;;  %v664_v14 = vld [vmem:[%s747_s25 + $0x64] ss:$8 sps:$4 sm:$0xff]   ;;  %v666_v15 = vld [vmem:[%s747_s25 + $0x60] ss:$8 sps:$4 sm:$0xff]  }
  0x1b   : > { %v667_v16 = vld [vmem:[%s747_s25 + $0x74] ss:$8 sps:$4 sm:$0xff]   ;;  %v669_v17 = vld [vmem:[%s747_s25 + $0x70] ss:$8 sps:$4 sm:$0xff]   ;;  %v298_v18 = vld [vmem:[%s742_s21] sm:$0xf] }
  0x1c   : > { %398 = vmatpush1.bf16.msra.mxu0 %v651_v5  ;;  %v296_v19 = vld [vmem:[#allocation2] sm:$0xff]  ;;  %v297_v20 = vld [vmem:[#allocation2 + $0x8] sm:$0xff] }
  0x1d   : > { %399 = vmatprep.subr.bf16.mxu0 %v652_v6  ;;  %v444_v27 = vld [vmem:[%s785_s2] sm:$0xff] (!%p612_p7) }
  0x1e   : > { %v445_v30 = vunpack.c.l.bf16 (!%p612_p7), %v444_v27  ;;  %v446_v31 = vunpack.c.h.bf16 (!%p612_p7), %v444_v27 }
  0x20   : > { %400 = vmatpush1.bf16.msra.mxu0 %v654_v7 }
  0x21   : > { %401 = vmatprep.subr.bf16.mxu0 %v655_v8 }
  0x24   : > { %402 = vmatpush1.bf16.msra.mxu0 %v657_v9 }
  0x25   : > { %403 = vmatprep.subr.bf16.mxu0 %v658_v10 }
  0x28   : > { %404 = vmatpush1.bf16.msra.mxu0 %v660_v11 }
  0x29   : > { %405 = vmatprep.subr.bf16.mxu0 %v661_v12 }
  0x2c   : > { %406 = vmatpush1.bf16.msra.mxu0 %v663_v13 }
  0x2d   : > { %407 = vmatprep.subr.bf16.mxu0 %v664_v14 }
  0x30   : > { %408 = vmatpush1.bf16.msra.mxu0 %v666_v15 }
  0x31   : > { %409 = vmatprep.subr.bf16.mxu0 %v667_v16 }
  0x34   : > { %410 = vmatpush1.bf16.msra.mxu0 %v669_v17 }
  0x37   : > { %428 = vmatmul.mubr.bf16.vlgmr.msra.gmra.mrb[0].mxu0 %v298_v18 }
 0x108   : > { %443 = sbr.rel (%p612_p7) target bundleno = 283 (0x11b), region = 40 }
 0x10a   : > { %v429_v21 = vpop.f32.mrb[0].mxu0 }
 0x10b   : > { %v436_v22 = vadd.f32 %v429_v21, %v296_v19  ;;  %v431_v23 = vpop.f32.mrb[1].mxu0 }
 0x10c   : > { %v437_v24 = vadd.f32 %v431_v23, %v297_v20  ;;  %v433_v25 = vpop.f32.mrb[2].mxu0 }
 0x10d   : > { %438 = vst [vmem:[#allocation2] sm:$0xff] %v436_v22  ;;  %v434_v26 = vpop.f32.mrb[3].mxu0 }
 0x10e   : > { %439 = vst [vmem:[#allocation2 + $0x8] sm:$0xff] %v437_v24 }
 0x114   : > { %v447_v28 = vld [vmem:[#allocation2] sm:$0xff] }
 0x115   : > { %v448_v29 = vld [vmem:[#allocation2 + $0x8] sm:$0xff]  ;;  %v449_v32 = vadd.f32 %v447_v28, %v445_v30 }
 0x116   : > { %v450_v33 = vadd.f32 %v448_v29, %v446_v31 }
 0x118   : > { %v619_v34 = vpack.c.bf16 %v450_v33, %v449_v32 }
 0x11a   : > { %459 = vst [vmem:[%s786_s3] sm:$0xff] %v619_v34 }
 0x11b PF: > { %s13_s14 = sadd.s32 1, %s692_s14   ;;  %s787_s12 = smov %s688_s13 }
 0x11c   : > { %p10_p8 = scmp.ge.s32.totalorder %s13_s14, 4   ;;  %s788_s13 = smov %s790_s15 }
 0x11e   :  { %12 = sbr.rel (!%p10_p8) target bundleno = 2 (0x2), region = 76 }

// kernel: baichuan2_block_forward.9
= control target key start
LH: loop header
LB: loop body
LE: loop exit
PB: predicated region body
PF: predicated region fallthrough
CT: control target
= control target key end

     0   :  { %11 = vsyncpa [#allocation7], 0  ;;  %s2509_s0 = inlined_call_operand.vmem [shape: bf16[8,256], index: 0, kind: input, shape index: {}, may-alias: {0,5}]   ;;  %s2510_s1 = inlined_call_operand.vmem [shape: f32[1,256], index: 1, kind: input, shape index: {}]   ;;  %s2511_s2 = inlined_call_operand.vmem [shape: bf16[256,512], index: 2, kind: input, shape index: {}]   ;;  %s2512_s3 = inlined_call_operand.vmem [shape: bf16[256,512], index: 3, kind: input, shape index: {}]   ;;  %s2513_s4 = inlined_call_operand.hbm [shape: bf16[512,256], index: 4, kind: input, shape index: {}]   ;;  %s2514_s5 = inlined_call_operand.vmem [shape: bf16[8,256], index: 5, kind: input, shape index: {}, may-alias: {0,5}]   ;;  %s2515_s6 = inlined_call_operand.hbm [shape: bf16[8,256], index: 6, kind: output, shape index: {}]  }
   0x1   :  { %13 = vsyncpa [#allocation7 + $0x1], 0 }
   0x2   :  { %14 = vsyncpa [#allocation8], 0  ;;  %s2107_s21 = smov 0   ;;  %s2109_s22 = smov 0  }
   0x3   :  { %s2111_s23 = smov 0   ;;  %s2113_s24 = smov 0  }
   0x4   :  { %s2115_s25 = smov 0   ;;  %s2117_s26 = smov 0  }
   0x5 LB: > { %s1608_s27 = sadd.s32 4294967295, %s2065_s26   ;;  %s29_s28 = sadd.s32 1, %s2061_s25  ;;  %s2065_s26 = sphi %s2117_s26, %s20_s26   ;;  %s2061_s25 = sphi %s2115_s25, %s2523_s25   ;;  %s2057_s24 = sphi %s2113_s24, %s2522_s24   ;;  %s2053_s23 = sphi %s2111_s23, %s2521_s23   ;;  %s2049_s22 = sphi %s2109_s22, %s2520_s22   ;;  %s2045_s21 = sphi %s2107_s21, %s2519_s21  }
   0x6   : > { %p30_p0 = scmp.ge.s32.totalorder %s29_s28, 2  ;;  %s86_s29 = sadd.s32 1, %s2053_s23 }
   0x7   : > { %p93_p1 = scmp.ne.s32.totalorder %s2053_s23, %s2049_s22  ;;  %p94_p2 = scmp.eq.s32.totalorder %s2065_s26, 0 }
   0x8   : > { %s2525_s28 = smov (%p30_p0, %s29_s28), 0  ;;  %p151_p4 = scmp.ne.s32.totalorder %s2049_s22, %s2045_s21 }
   0x9   : > { %p2143_p3 = por %p94_p2, %p93_p1  ;;  %s83_s7 = ssub.s32 %s2061_s25, %s2525_s28 }
   0xa   : > { %p152_p5 = scmp.eq.s32.totalorder %s1608_s27, 0  ;;  %p84_p6 = scmp.eq.s32.totalorder %s83_s7, 0 }
   0xb   : > { %p1612_p8 = scmp.ge.s32.totalorder %s2065_s26, 2 }
   0xc   : > { %p2152_p7 = por %p152_p5, %p151_p4 }
   0xd   : > { %s2157_s9 = scalar_select %p84_p6, %s2053_s23, %s86_s29  }
   0xe   : > { %242 = sbr.rel (%p1612_p8) target bundleno = 87 (0x57), region = 28 }
  0x15   : > { %245 = sbr.rel (!%p2143_p3) target bundleno = 41 (0x29), region = 32  ;;  %s247_s10 = sand.u32 (%p2143_p3), 1, %s2053_s23  }
  0x16   : > { %s1735_s11 = sshll.u32 (%p2143_p3), %s2061_s25, 3  ;;  %s1613_s12 = sshll.u32 (%p2143_p3), %s247_s10, 8 }
  0x17   : > { %s2167_s15 = scalar_lea.vmem (%p2143_p3), %s2511_s2, %s1735_s11  ;;  %s2172_s16 = scalar_lea.vmem (%p2143_p3), [#allocation4], %s1613_s12 }
  0x18   : > { %v342_v0 = vld [vmem:[%s2167_s15] sm:$0xff] (%p2143_p3)  ;;  %v344_v1 = vld [vmem:[%s2167_s15 + $0x10] sm:$0xff] (%p2143_p3) }
  0x19   : > { %v346_v2 = vld [vmem:[%s2167_s15 + $0x20] sm:$0xff] (%p2143_p3)  ;;  %343 = vst [vmem:[%s2172_s16] sm:$0xff] (%p2143_p3), %v342_v0  ;;  %345 = vst [vmem:[%s2172_s16 + $0x8] sm:$0xff] (%p2143_p3), %v344_v1  ;;  %v348_v3 = vld [vmem:[%s2167_s15 + $0x30] sm:$0xff] (%p2143_p3) }
  0x1a   : > { %347 = vst [vmem:[%s2172_s16 + $0x10] sm:$0xff] (%p2143_p3), %v346_v2  ;;  %v350_v4 = vld [vmem:[%s2167_s15 + $0x40] sm:$0xff] (%p2143_p3)  ;;  %v352_v5 = vld [vmem:[%s2167_s15 + $0x50] sm:$0xff] (%p2143_p3)  ;;  %349 = vst [vmem:[%s2172_s16 + $0x18] sm:$0xff] (%p2143_p3), %v348_v3 }
  0x1b   : > { %351 = vst [vmem:[%s2172_s16 + $0x20] sm:$0xff] (%p2143_p3), %v350_v4  ;;  %353 = vst [vmem:[%s2172_s16 + $0x28] sm:$0xff] (%p2143_p3), %v352_v5  ;;  %v354_v6 = vld [vmem:[%s2167_s15 + $0x60] sm:$0xff] (%p2143_p3)  ;;  %v356_v7 = vld [vmem:[%s2167_s15 + $0x70] sm:$0xff] (%p2143_p3) }
  0x1c   : > { %v358_v8 = vld [vmem:[%s2167_s15 + $0x80] sm:$0xff]  ;;  %355 = vst [vmem:[%s2172_s16 + $0x30] sm:$0xff] %v354_v6  ;;  %357 = vst [vmem:[%s2172_s16 + $0x38] sm:$0xff] %v356_v7  ;;  %v360_v9 = vld [vmem:[%s2167_s15 + $0x90] sm:$0xff] }
  0x1d   : > { %359 = vst [vmem:[%s2172_s16 + $0x40] sm:$0xff] %v358_v8  ;;  %v362_v10 = vld [vmem:[%s2167_s15 + $0xa0] sm:$0xff]  ;;  %v364_v11 = vld [vmem:[%s2167_s15 + $0xb0] sm:$0xff]  ;;  %361 = vst [vmem:[%s2172_s16 + $0x48] sm:$0xff] %v360_v9 }
  0x1e   : > { %363 = vst [vmem:[%s2172_s16 + $0x50] sm:$0xff] %v362_v10  ;;  %365 = vst [vmem:[%s2172_s16 + $0x58] sm:$0xff] %v364_v11  ;;  %v366_v12 = vld [vmem:[%s2167_s15 + $0xc0] sm:$0xff]  ;;  %v368_v13 = vld [vmem:[%s2167_s15 + $0xd0] sm:$0xff] }
  0x1f   : > { %v370_v14 = vld [vmem:[%s2167_s15 + $0xe0] sm:$0xff]  ;;  %367 = vst [vmem:[%s2172_s16 + $0x60] sm:$0xff] %v366_v12  ;;  %369 = vst [vmem:[%s2172_s16 + $0x68] sm:$0xff] %v368_v13  ;;  %v372_v15 = vld [vmem:[%s2167_s15 + $0xf0] sm:$0xff] }
  0x20   : > { %371 = vst [vmem:[%s2172_s16 + $0x70] sm:$0xff] %v370_v14  ;;  %v374_v16 = vld [vmem:[%s2167_s15 + $0x100] sm:$0xff]  ;;  %v376_v17 = vld [vmem:[%s2167_s15 + $0x110] sm:$0xff]  ;;  %373 = vst [vmem:[%s2172_s16 + $0x78] sm:$0xff] %v372_v15 }
  0x21   : > { %375 = vst [vmem:[%s2172_s16 + $0x80] sm:$0xff] %v374_v16  ;;  %377 = vst [vmem:[%s2172_s16 + $0x88] sm:$0xff] %v376_v17  ;;  %v378_v18 = vld [vmem:[%s2167_s15 + $0x120] sm:$0xff]  ;;  %v380_v19 = vld [vmem:[%s2167_s15 + $0x130] sm:$0xff] }
  0x22   : > { %v382_v20 = vld [vmem:[%s2167_s15 + $0x140] sm:$0xff]  ;;  %379 = vst [vmem:[%s2172_s16 + $0x90] sm:$0xff] %v378_v18  ;;  %381 = vst [vmem:[%s2172_s16 + $0x98] sm:$0xff] %v380_v19  ;;  %v384_v21 = vld [vmem:[%s2167_s15 + $0x150] sm:$0xff] }
  0x23   : > { %383 = vst [vmem:[%s2172_s16 + $0xa0] sm:$0xff] %v382_v20  ;;  %v386_v22 = vld [vmem:[%s2167_s15 + $0x160] sm:$0xff]  ;;  %v388_v23 = vld [vmem:[%s2167_s15 + $0x170] sm:$0xff]  ;;  %385 = vst [vmem:[%s2172_s16 + $0xa8] sm:$0xff] %v384_v21 }
  0x24   : > { %387 = vst [vmem:[%s2172_s16 + $0xb0] sm:$0xff] %v386_v22  ;;  %389 = vst [vmem:[%s2172_s16 + $0xb8] sm:$0xff] %v388_v23  ;;  %v390_v24 = vld [vmem:[%s2167_s15 + $0x180] sm:$0xff]  ;;  %v392_v25 = vld [vmem:[%s2167_s15 + $0x190] sm:$0xff] }
  0x25   : > { %v394_v26 = vld [vmem:[%s2167_s15 + $0x1a0] sm:$0xff]  ;;  %391 = vst [vmem:[%s2172_s16 + $0xc0] sm:$0xff] %v390_v24  ;;  %393 = vst [vmem:[%s2172_s16 + $0xc8] sm:$0xff] %v392_v25  ;;  %v396_v27 = vld [vmem:[%s2167_s15 + $0x1b0] sm:$0xff] }
  0x26   : > { %395 = vst [vmem:[%s2172_s16 + $0xd0] sm:$0xff] %v394_v26  ;;  %v398_v28 = vld [vmem:[%s2167_s15 + $0x1c0] sm:$0xff]  ;;  %v400_v29 = vld [vmem:[%s2167_s15 + $0x1d0] sm:$0xff]  ;;  %397 = vst [vmem:[%s2172_s16 + $0xd8] sm:$0xff] %v396_v27 }
  0x27   : > { %399 = vst [vmem:[%s2172_s16 + $0xe0] sm:$0xff] %v398_v28  ;;  %401 = vst [vmem:[%s2172_s16 + $0xe8] sm:$0xff] %v400_v29  ;;  %v402_v30 = vld [vmem:[%s2167_s15 + $0x1e0] sm:$0xff]  ;;  %v404_v31 = vld [vmem:[%s2167_s15 + $0x1f0] sm:$0xff] }
  0x28   : > { %403 = vst [vmem:[%s2172_s16 + $0xf0] sm:$0xff] %v402_v30  ;;  %405 = vst [vmem:[%s2172_s16 + $0xf8] sm:$0xff] %v404_v31 }
  0x29 PF: > { %411 = sbr.rel (!%p2143_p3) target bundleno = 61 (0x3d), region = 70  ;;  %s413_s17 = sand.u32 (%p2143_p3), 1, %s2053_s23  }
  0x2a   : > { %s1736_s18 = sshll.u32 (%p2143_p3), %s2061_s25, 3  ;;  %s1616_s19 = sshll.u32 (%p2143_p3), %s413_s17, 8 }
  0x2b   : > { %s2242_s29 = scalar_lea.vmem (%p2143_p3), %s2512_s3, %s1736_s18  ;;  %s2247_s7 = scalar_lea.vmem (%p2143_p3), [#allocation5], %s1616_s19 }
  0x2c   : > { %v508_v32 = vld [vmem:[%s2242_s29] sm:$0xff] (%p2143_p3)  ;;  %v510_v33 = vld [vmem:[%s2242_s29 + $0x10] sm:$0xff] (%p2143_p3) }
  0x2d   : > { %v512_v34 = vld [vmem:[%s2242_s29 + $0x20] sm:$0xff] (%p2143_p3)  ;;  %509 = vst [vmem:[%s2247_s7] sm:$0xff] (%p2143_p3), %v508_v32  ;;  %511 = vst [vmem:[%s2247_s7 + $0x8] sm:$0xff] (%p2143_p3), %v510_v33  ;;  %v514_v35 = vld [vmem:[%s2242_s29 + $0x30] sm:$0xff] (%p2143_p3) }
  0x2e   : > { %513 = vst [vmem:[%s2247_s7 + $0x10] sm:$0xff] (%p2143_p3), %v512_v34  ;;  %v516_v36 = vld [vmem:[%s2242_s29 + $0x40] sm:$0xff] (%p2143_p3)  ;;  %v518_v37 = vld [vmem:[%s2242_s29 + $0x50] sm:$0xff] (%p2143_p3)  ;;  %515 = vst [vmem:[%s2247_s7 + $0x18] sm:$0xff] (%p2143_p3), %v514_v35 }
  0x2f   : > { %517 = vst [vmem:[%s2247_s7 + $0x20] sm:$0xff] (%p2143_p3), %v516_v36  ;;  %519 = vst [vmem:[%s2247_s7 + $0x28] sm:$0xff] (%p2143_p3), %v518_v37  ;;  %v520_v38 = vld [vmem:[%s2242_s29 + $0x60] sm:$0xff] (%p2143_p3)  ;;  %v522_v39 = vld [vmem:[%s2242_s29 + $0x70] sm:$0xff] (%p2143_p3) }
  0x30   : > { %v524_v40 = vld [vmem:[%s2242_s29 + $0x80] sm:$0xff]  ;;  %521 = vst [vmem:[%s2247_s7 + $0x30] sm:$0xff] %v520_v38  ;;  %523 = vst [vmem:[%s2247_s7 + $0x38] sm:$0xff] %v522_v39  ;;  %v526_v41 = vld [vmem:[%s2242_s29 + $0x90] sm:$0xff] }
  0x31   : > { %525 = vst [vmem:[%s2247_s7 + $0x40] sm:$0xff] %v524_v40  ;;  %v528_v42 = vld [vmem:[%s2242_s29 + $0xa0] sm:$0xff]  ;;  %v530_v43 = vld [vmem:[%s2242_s29 + $0xb0] sm:$0xff]  ;;  %527 = vst [vmem:[%s2247_s7 + $0x48] sm:$0xff] %v526_v41 }
  0x32   : > { %529 = vst [vmem:[%s2247_s7 + $0x50] sm:$0xff] %v528_v42  ;;  %531 = vst [vmem:[%s2247_s7 + $0x58] sm:$0xff] %v530_v43  ;;  %v532_v44 = vld [vmem:[%s2242_s29 + $0xc0] sm:$0xff]  ;;  %v534_v45 = vld [vmem:[%s2242_s29 + $0xd0] sm:$0xff] }
  0x33   : > { %v536_v46 = vld [vmem:[%s2242_s29 + $0xe0] sm:$0xff]  ;;  %533 = vst [vmem:[%s2247_s7 + $0x60] sm:$0xff] %v532_v44  ;;  %535 = vst [vmem:[%s2247_s7 + $0x68] sm:$0xff] %v534_v45  ;;  %v538_v47 = vld [vmem:[%s2242_s29 + $0xf0] sm:$0xff] }
  0x34   : > { %537 = vst [vmem:[%s2247_s7 + $0x70] sm:$0xff] %v536_v46  ;;  %v540_v48 = vld [vmem:[%s2242_s29 + $0x100] sm:$0xff]  ;;  %v542_v49 = vld [vmem:[%s2242_s29 + $0x110] sm:$0xff]  ;;  %539 = vst [vmem:[%s2247_s7 + $0x78] sm:$0xff] %v538_v47 }
  0x35   : > { %541 = vst [vmem:[%s2247_s7 + $0x80] sm:$0xff] %v540_v48  ;;  %543 = vst [vmem:[%s2247_s7 + $0x88] sm:$0xff] %v542_v49  ;;  %v544_v50 = vld [vmem:[%s2242_s29 + $0x120] sm:$0xff]  ;;  %v546_v51 = vld [vmem:[%s2242_s29 + $0x130] sm:$0xff] }
  0x36   : > { %v548_v52 = vld [vmem:[%s2242_s29 + $0x140] sm:$0xff]  ;;  %545 = vst [vmem:[%s2247_s7 + $0x90] sm:$0xff] %v544_v50  ;;  %547 = vst [vmem:[%s2247_s7 + $0x98] sm:$0xff] %v546_v51  ;;  %v550_v53 = vld [vmem:[%s2242_s29 + $0x150] sm:$0xff] }
  0x37   : > { %549 = vst [vmem:[%s2247_s7 + $0xa0] sm:$0xff] %v548_v52  ;;  %v552_v54 = vld [vmem:[%s2242_s29 + $0x160] sm:$0xff]  ;;  %v554_v55 = vld [vmem:[%s2242_s29 + $0x170] sm:$0xff]  ;;  %551 = vst [vmem:[%s2247_s7 + $0xa8] sm:$0xff] %v550_v53 }
  0x38   : > { %553 = vst [vmem:[%s2247_s7 + $0xb0] sm:$0xff] %v552_v54  ;;  %555 = vst [vmem:[%s2247_s7 + $0xb8] sm:$0xff] %v554_v55  ;;  %v556_v56 = vld [vmem:[%s2242_s29 + $0x180] sm:$0xff]  ;;  %v558_v57 = vld [vmem:[%s2242_s29 + $0x190] sm:$0xff] }
  0x39   : > { %v560_v58 = vld [vmem:[%s2242_s29 + $0x1a0] sm:$0xff]  ;;  %557 = vst [vmem:[%s2247_s7 + $0xc0] sm:$0xff] %v556_v56  ;;  %559 = vst [vmem:[%s2247_s7 + $0xc8] sm:$0xff] %v558_v57  ;;  %v562_v59 = vld [vmem:[%s2242_s29 + $0x1b0] sm:$0xff] }
  0x3a   : > { %561 = vst [vmem:[%s2247_s7 + $0xd0] sm:$0xff] %v560_v58  ;;  %v564_v60 = vld [vmem:[%s2242_s29 + $0x1c0] sm:$0xff]  ;;  %v566_v61 = vld [vmem:[%s2242_s29 + $0x1d0] sm:$0xff]  ;;  %563 = vst [vmem:[%s2247_s7 + $0xd8] sm:$0xff] %v562_v59 }
  0x3b   : > { %565 = vst [vmem:[%s2247_s7 + $0xe0] sm:$0xff] %v564_v60  ;;  %567 = vst [vmem:[%s2247_s7 + $0xe8] sm:$0xff] %v566_v61  ;;  %v568_v62 = vld [vmem:[%s2242_s29 + $0x1e0] sm:$0xff]  ;;  %v570_v63 = vld [vmem:[%s2242_s29 + $0x1f0] sm:$0xff] }
  0x3c   : > { %569 = vst [vmem:[%s2247_s7 + $0xf0] sm:$0xff] %v568_v62  ;;  %571 = vst [vmem:[%s2247_s7 + $0xf8] sm:$0xff] %v570_v63 }
  0x3d PF: > { %s578_s10 = sand.u32 1, %s2053_s23   ;;  %s1738_s11 = sshll.u32 %s2061_s25, 12 }
  0x3e   : > { %s1619_s12 = sshll.u32 %s578_s10, 8  ;;  %s2315_s15 = scalar_lea.hbm %s2513_s4, %s1738_s11 }
  0x3f   : > { %s582_s16 = scalar_lea.vmem [#allocation6], %s1619_s12  ;;  %s2319_s18 = scalar_lea.sflag [#allocation7], %s578_s10 }
  0x40   : > { %s590_s17 = sshll.u32 %s582_s16, 4  ;;  %s1957_s19 = scalar_lea.hbm %s2315_s15, 4096  ;;  %s2317_s17 = int_to_ptr.vmem [resolvable:$true] %s590_s17 }
  0x41   : > { %p1958_p9 = scmp.ne.s32.totalorder %s2315_s15, %s1957_s19  ;;  %s1961_s29 = scalar_lea.hbm %s2513_s4, 8192 }
  0x42   : > { %p1962_p12 = scmp.lt.u32.totalorder %s2315_s15, %s2513_s4  ;;  %p1963_p13 = scmp.lt.u32.totalorder %s1961_s29, %s1957_s19 }
  0x43   : > { %p1959_p10 = pnand %p1958_p9, %p2143_p3  ;;  %p1965_p1 = scmp.lt.u32.totalorder %s1957_s19, %s2315_s15 }
  0x44   : > { %p1964_p0 = por %p1963_p13, %p1962_p12 }
  0x45   : > { %p1960_p11 = pneg %p1959_p10 }
  0x46   : > { %p1966_p2 = por %p1965_p1, %p1964_p0 }
  0x48   : > { %p1967_p4 = pnand %p1966_p2, %p1960_p11 }
  0x4a   : > { %1970 = shalt.err (!%p1967_p4)
}
  0x4b   : > { %s1971_s10 = scalar_lea.vmem %s2317_s17, 4096  ;;  %s2067_s12 = smov [#allocation6]  }
  0x4c   : > { %p1972_p5 = scmp.ne.s32.totalorder %s2317_s17, %s1971_s10  ;;  %s1975_s13 = sshll.u32 %s2067_s12, 4  ;;  %s1976_s13 = int_to_ptr.vmem [resolvable:$false] %s1975_s13 }
  0x4d   : > { %s1977_s14 = scalar_lea.vmem %s1976_s13, 8192  ;;  %p1978_p9 = scmp.lt.s32.totalorder %s2317_s17, %s1976_s13 }
  0x4e   : > { %p1973_p6 = pnand %p1972_p5, %p2143_p3  ;;  %p1979_p10 = scmp.lt.s32.totalorder %s1977_s14, %s1971_s10 }
  0x50   : > { %p1974_p8 = pneg %p1973_p6  ;;  %p1980_p12 = por %p1979_p10, %p1978_p9 }
  0x52   : > { %p1981_p13 = pnand %p1980_p12, %p1974_p8 }
  0x54   : > { %1984 = shalt.err (!%p1981_p13)
}
  0x55   : > { %s2068_s16 = smov 128   ;;  %s2069_s19 = smov 8  }
  0x56   : > { %1741 = dma.hbm_to_vmem [thread:$0]  (%p2143_p3), %s2315_s15, 4096, %s2317_s17, %s2319_s18, %s2068_s16, %s2068_s16, %s2069_s19  }
  0x57 PF: > { %p1623_p11 = scmp.ge.s32.totalorder %s2065_s26, 1  ;;  %p598_p0 = scmp.lt.s32.totalorder %s2065_s26, 3 }
  0x59   : > { %p599_p1 = pnand %p1623_p11, %p598_p0 }
  0x5a   : > { %s605_s20 = sand.u32 (!%p599_p1), 1, %s2049_s22  }
  0x5b   : > { %602 = sbr.rel (%p599_p1) target bundleno = 835 (0x343), region = 112  ;;  %s1624_s21 = sshll.u32 (!%p599_p1), %s605_s20, 8 }
  0x5c   : > { %s2346_s29 = scalar_lea.vmem (!%p599_p1), [#allocation4], %s1624_s21  ;;  %s2348_s7 = scalar_lea.vmem (!%p599_p1), [#allocation5], %s1624_s21 }
  0x5d   : > { %s619_s11 = scalar_lea.sflag (!%p599_p1), [#allocation7], %s605_s20  ;;  %s2350_s10 = scalar_lea.vmem (!%p599_p1), [#allocation6], %s1624_s21 }
  0x62   : > { %2036 = dma.done.wait (%p2152_p7), %s619_s11, 4096  }
  0x63   : > { %2038 = vsyncadd (%p2152_p7), %s619_s11, 4294963200  ;;  %p1627_p3 = scmp.ne.s32.totalorder %s2057_s24, 0 }
  0x64   : > { %v683_v0 = vld [vmem:[%s2509_s0] sm:$0xff] (!%p1627_p3)  ;;  %v2070_v1 = vmov (!%p1627_p3), 0.0   ;;  %v699_v9 = vlaneseq (!%p1627_p3) }
  0x65   : > { %680 = sbr.rel (%p1627_p3) target bundleno = 271 (0x10f), region = 128  ;;  %681 = vst [vmem:[#allocation2] sm:$0xff] (!%p1627_p3), %v2070_v1  ;;  %682 = vst [vmem:[#allocation2 + $0x8] sm:$0xff] (!%p1627_p3), %v2070_v1  ;;  %v684_v2 = vunpack.c.l.bf16 (!%p1627_p3), %v683_v0  ;;  %v685_v3 = vunpack.c.h.bf16 (!%p1627_p3), %v683_v0  ;;  %v697_v14 = vld [vmem:[%s2510_s1] sm:$0x3] (!%p1627_p3) }
  0x66   : > { %v700_v11 = vshrl.u32 (!%p1627_p3), %v699_v9, 7 }
  0x67   : > { %v686_v4 = vmul.f32 (!%p1627_p3), %v684_v2, %v684_v2  ;;  %v687_v5 = vmul.f32 (!%p1627_p3), %v685_v3, %v685_v3 }
  0x68   : > { %v701_v12 = vsub.s32 (!%p1627_p3), 0, %v700_v11  ;;  %v705_v13 = vsub.s32 (!%p1627_p3), 1, %v700_v11 }
  0x69   : > { %v688_v6 = vadd.f32 (!%p1627_p3), %v687_v5, %v686_v4 }
  0x6a   : > { %v702_v15 = vrot.slane (!%p1627_p3), %v697_v14, %v701_v12  ;;  %v706_v16 = vrot.slane (!%p1627_p3), %v697_v14, %v705_v13 }
  0x6b   : > { %689 = vadd.xlane.f32.xlu0 (!%p1627_p3), %v688_v6 }
  0xf8   : > { %v690_v7 = vpop.xlane.xlu0 %689 }
  0xf9   : > { %v692_v8 = vmul.f32 0.00390625, %v690_v7 }
  0xfb   : > { %v693_v10 = vadd.f32 1e-06, %v692_v8 }
  0xfd   : > { %1801 = vrsqrt.f32 %v693_v10 }
 0x107   : > { %v1802_v17 = vpop.eup %1801 }
 0x108   : > { %v695_v18 = vmul.f32 %v1802_v17, %v684_v2  ;;  %v696_v19 = vmul.f32 %v1802_v17, %v685_v3 }
 0x10a   : > { %v709_v20 = vmul.f32 %v702_v15, %v695_v18  ;;  %v710_v21 = vmul.f32 %v706_v16, %v696_v19 }
 0x10c   : > { %v1739_v22 = vpack.c.bf16 %v710_v21, %v709_v20 }
 0x10e   : > { %719 = vst [vmem:[#allocation3] sm:$0xff] %v1739_v22 }
 0x10f PF: > { %v1803_v23 = vld [vmem:[%s2346_s29 + $0x4] ss:$8 sps:$4 sm:$0xff]   ;;  %v1805_v24 = vld [vmem:[%s2346_s29] ss:$8 sps:$4 sm:$0xff]   ;;  %v1806_v25 = vld [vmem:[%s2346_s29 + $0x14] ss:$8 sps:$4 sm:$0xff]  }
 0x110   : > { %920 = vmatprep.subr.bf16.mxu0 %v1803_v23  ;;  %v1808_v26 = vld [vmem:[%s2346_s29 + $0x10] ss:$8 sps:$4 sm:$0xff]   ;;  %v1809_v27 = vld [vmem:[%s2346_s29 + $0x24] ss:$8 sps:$4 sm:$0xff]   ;;  %v1811_v28 = vld [vmem:[%s2346_s29 + $0x20] ss:$8 sps:$4 sm:$0xff]  }
 0x111   : > { %921 = vmatpush1.bf16.msra.mxu0 %v1805_v24  ;;  %v1812_v29 = vld [vmem:[%s2346_s29 + $0x34] ss:$8 sps:$4 sm:$0xff]   ;;  %v1824_v30 = vld [vmem:[%s2348_s7 + $0x4] ss:$8 sps:$4 sm:$0xff]   ;;  %v1826_v31 = vld [vmem:[%s2348_s7] ss:$8 sps:$4 sm:$0xff]  }
 0x112   : > { %922 = vmatprep.subr.bf16.mxu0 %v1806_v25  ;;  %v1814_v32 = vld [vmem:[%s2346_s29 + $0x30] ss:$8 sps:$4 sm:$0xff]   ;;  %v1815_v33 = vld [vmem:[%s2346_s29 + $0x44] ss:$8 sps:$4 sm:$0xff]   ;;  %1153 = vmatprep.subr.bf16.mxu1 %v1824_v30  ;;  %v1830_v34 = vld [vmem:[%s2348_s7 + $0x14] ss:$8 sps:$4 sm:$0xff]  }
 0x113   : > { %1154 = vmatpush1.bf16.msra.mxu1 %v1826_v31  ;;  %v1832_v35 = vld [vmem:[%s2348_s7 + $0x10] ss:$8 sps:$4 sm:$0xff]   ;;  %v1817_v36 = vld [vmem:[%s2346_s29 + $0x40] ss:$8 sps:$4 sm:$0xff]   ;;  %v1836_v37 = vld [vmem:[%s2348_s7 + $0x24] ss:$8 sps:$4 sm:$0xff]  }
 0x114   : > { %1155 = vmatprep.subr.bf16.mxu1 %v1830_v34  ;;  %v1818_v38 = vld [vmem:[%s2346_s29 + $0x54] ss:$8 sps:$4 sm:$0xff]   ;;  %v1838_v39 = vld [vmem:[%s2348_s7 + $0x20] ss:$8 sps:$4 sm:$0xff]   ;;  %v1820_v41 = vld [vmem:[%s2346_s29 + $0x50] ss:$8 sps:$4 sm:$0xff]  }
 0x115   : > { %923 = vmatpush1.bf16.msra.mxu0 %v1808_v26  ;;  %v1842_v40 = vld [vmem:[%s2348_s7 + $0x34] ss:$8 sps:$4 sm:$0xff]   ;;  %v1821_v42 = vld [vmem:[%s2346_s29 + $0x64] ss:$8 sps:$4 sm:$0xff]   ;;  %v1844_v43 = vld [vmem:[%s2348_s7 + $0x30] ss:$8 sps:$4 sm:$0xff]  }
 0x116   : > { %924 = vmatprep.subr.bf16.mxu0 %v1809_v27  ;;  %v1848_v44 = vld [vmem:[%s2348_s7 + $0x44] ss:$8 sps:$4 sm:$0xff]   ;;  %v1823_v45 = vld [vmem:[%s2346_s29 + $0x60] ss:$8 sps:$4 sm:$0xff]   ;;  %v1827_v46 = vld [vmem:[%s2346_s29 + $0x74] ss:$8 sps:$4 sm:$0xff]  }
 0x117   : > { %1156 = vmatpush1.bf16.msra.mxu1 %v1832_v35  ;;  %v1850_v47 = vld [vmem:[%s2348_s7 + $0x40] ss:$8 sps:$4 sm:$0xff]   ;;  %v1854_v48 = vld [vmem:[%s2348_s7 + $0x54] ss:$8 sps:$4 sm:$0xff]   ;;  %v1829_v49 = vld [vmem:[%s2346_s29 + $0x70] ss:$8 sps:$4 sm:$0xff]  }
 0x118   : > { %1157 = vmatprep.subr.bf16.mxu1 %v1836_v37  ;;  %v1833_v50 = vld [vmem:[%s2346_s29 + $0x84] ss:$8 sps:$4 sm:$0xff]   ;;  %v1856_v51 = vld [vmem:[%s2348_s7 + $0x50] ss:$8 sps:$4 sm:$0xff]   ;;  %v1835_v53 = vld [vmem:[%s2346_s29 + $0x80] ss:$8 sps:$4 sm:$0xff]  }
 0x119   : > { %925 = vmatpush1.bf16.msra.mxu0 %v1811_v28  ;;  %v1860_v52 = vld [vmem:[%s2348_s7 + $0x64] ss:$8 sps:$4 sm:$0xff]   ;;  %v1839_v54 = vld [vmem:[%s2346_s29 + $0x94] ss:$8 sps:$4 sm:$0xff]   ;;  %v1862_v55 = vld [vmem:[%s2348_s7 + $0x60] ss:$8 sps:$4 sm:$0xff]  }
 0x11a   : > { %926 = vmatprep.subr.bf16.mxu0 %v1812_v29  ;;  %v1866_v56 = vld [vmem:[%s2348_s7 + $0x74] ss:$8 sps:$4 sm:$0xff]   ;;  %v1841_v58 = vld [vmem:[%s2346_s29 + $0x90] ss:$8 sps:$4 sm:$0xff]   ;;  %v1845_v60 = vld [vmem:[%s2346_s29 + $0xa4] ss:$8 sps:$4 sm:$0xff]  }
 0x11b   : > { %1158 = vmatpush1.bf16.msra.mxu1 %v1838_v39  ;;  %v720_v57 = vld [vmem:[#allocation3] sm:$0xff]  ;;  %v1872_v62 = vld [vmem:[%s2348_s7 + $0x84] ss:$8 sps:$4 sm:$0xff]   ;;  %v1847_v63 = vld [vmem:[%s2346_s29 + $0xa0] ss:$8 sps:$4 sm:$0xff]   ;;  %p1729_p7 = scmp.ne.s32.totalorder %s2057_s24, 1 }
 0x11c   : > { %1159 = vmatprep.subr.bf16.mxu1 %v1842_v40  ;;  %v1630_v59 = vcombine.high %v720_v57, %v720_v57  ;;  %v1868_v61 = vld [vmem:[%s2348_s7 + $0x70] ss:$8 sps:$4 sm:$0xff]   ;;  %v1851_v0 = vld [vmem:[%s2346_s29 + $0xb4] ss:$8 sps:$4 sm:$0xff]   ;;  %v1874_v1 = vld [vmem:[%s2348_s7 + $0x80] ss:$8 sps:$4 sm:$0xff]   ;;  %v1629_v22 = vcombine.low %v720_v57, %v720_v57 }
 0x11d   : > { %927 = vmatpush1.bf16.msra.mxu0 %v1814_v32  ;;  %v1878_v2 = vld [vmem:[%s2348_s7 + $0x94] ss:$8 sps:$4 sm:$0xff]   ;;  %v1853_v3 = vld [vmem:[%s2346_s29 + $0xb0] ss:$8 sps:$4 sm:$0xff]   ;;  %v1857_v4 = vld [vmem:[%s2346_s29 + $0xc4] ss:$8 sps:$4 sm:$0xff]  }
 0x11e   : > { %928 = vmatprep.subr.bf16.mxu0 %v1815_v33  ;;  %952 = vmatprep.mubr.bf16.mxu0 %v1630_v59  ;;  %v1880_v5 = vld [vmem:[%s2348_s7 + $0x90] ss:$8 sps:$4 sm:$0xff]   ;;  %v1883_v6 = vld [vmem:[%s2348_s7 + $0xa4] ss:$8 sps:$4 sm:$0xff]   ;;  %v1859_v7 = vld [vmem:[%s2346_s29 + $0xc0] ss:$8 sps:$4 sm:$0xff]  }
 0x11f   : > { %1160 = vmatpush1.bf16.msra.mxu1 %v1844_v43  ;;  %1185 = vmatprep.mubr.bf16.mxu1 %v1630_v59  ;;  %v1863_v8 = vld [vmem:[%s2346_s29 + $0xd4] ss:$8 sps:$4 sm:$0xff]   ;;  %v1885_v9 = vld [vmem:[%s2348_s7 + $0xa0] ss:$8 sps:$4 sm:$0xff]   ;;  %v1865_v11 = vld [vmem:[%s2346_s29 + $0xd0] ss:$8 sps:$4 sm:$0xff]  }
 0x120   : > { %1161 = vmatprep.subr.bf16.mxu1 %v1848_v44  ;;  %v1886_v10 = vld [vmem:[%s2348_s7 + $0xb4] ss:$8 sps:$4 sm:$0xff]   ;;  %v1869_v12 = vld [vmem:[%s2346_s29 + $0xe4] ss:$8 sps:$4 sm:$0xff]   ;;  %v1871_v13 = vld [vmem:[%s2346_s29 + $0xe0] ss:$8 sps:$4 sm:$0xff]  }
 0x121   : > { %929 = vmatpush1.bf16.msra.mxu0 %v1817_v36  ;;  %v1888_v14 = vld [vmem:[%s2348_s7 + $0xb0] ss:$8 sps:$4 sm:$0xff]   ;;  %v1889_v15 = vld [vmem:[%s2348_s7 + $0xc4] ss:$8 sps:$4 sm:$0xff]   ;;  %v1875_v16 = vld [vmem:[%s2346_s29 + $0xf4] ss:$8 sps:$4 sm:$0xff]  }
 0x122   : > { %930 = vmatprep.subr.bf16.mxu0 %v1818_v38  ;;  %v1891_v17 = vld [vmem:[%s2348_s7 + $0xc0] ss:$8 sps:$4 sm:$0xff]   ;;  %v1892_v18 = vld [vmem:[%s2348_s7 + $0xd4] ss:$8 sps:$4 sm:$0xff]   ;;  %v1877_v19 = vld [vmem:[%s2346_s29 + $0xf0] ss:$8 sps:$4 sm:$0xff]  }
 0x123   : > { %1162 = vmatpush1.bf16.msra.mxu1 %v1850_v47  ;;  %v1903_v20 = vld [vmem:[%s2350_s10 + $0x4] ss:$8 sps:$4 sm:$0xff]   ;;  %v1894_v21 = vld [vmem:[%s2348_s7 + $0xd0] ss:$8 sps:$4 sm:$0xff]   ;;  %v1901_v24 = vld [vmem:[%s2350_s10] ss:$8 sps:$4 sm:$0xff]  }
 0x124   : > { %1163 = vmatprep.subr.bf16.mxu1 %v1854_v48  ;;  %v1895_v23 = vld [vmem:[%s2348_s7 + $0xe4] ss:$8 sps:$4 sm:$0xff]   ;;  %v1906_v25 = vld [vmem:[%s2350_s10 + $0x14] ss:$8 sps:$4 sm:$0xff]   ;;  %v1897_v26 = vld [vmem:[%s2348_s7 + $0xe0] ss:$8 sps:$4 sm:$0xff]  }
 0x125   : > { %931 = vmatpush1.bf16.msra.mxu0 %v1820_v41  ;;  %v1898_v27 = vld [vmem:[%s2348_s7 + $0xf4] ss:$8 sps:$4 sm:$0xff]   ;;  %v1904_v28 = vld [vmem:[%s2350_s10 + $0x10] ss:$8 sps:$4 sm:$0xff]   ;;  %v1909_v29 = vld [vmem:[%s2350_s10 + $0x24] ss:$8 sps:$4 sm:$0xff]  }
 0x126   : > { %932 = vmatprep.subr.bf16.mxu0 %v1821_v42  ;;  %v1900_v30 = vld [vmem:[%s2348_s7 + $0xf0] ss:$8 sps:$4 sm:$0xff]   ;;  %v1907_v31 = vld [vmem:[%s2350_s10 + $0x20] ss:$8 sps:$4 sm:$0xff]   ;;  %v1912_v32 = vld [vmem:[%s2350_s10 + $0x34] ss:$8 sps:$4 sm:$0xff]  }
 0x127   : > { %1164 = vmatpush1.bf16.msra.mxu1 %v1856_v51  ;;  %v1910_v33 = vld [vmem:[%s2350_s10 + $0x30] ss:$8 sps:$4 sm:$0xff]   ;;  %v1915_v34 = vld [vmem:[%s2350_s10 + $0x44] ss:$8 sps:$4 sm:$0xff]   ;;  %v1913_v35 = vld [vmem:[%s2350_s10 + $0x40] ss:$8 sps:$4 sm:$0xff]  }
 0x128   : > { %1165 = vmatprep.subr.bf16.mxu1 %v1860_v52  ;;  %v1918_v36 = vld [vmem:[%s2350_s10 + $0x54] ss:$8 sps:$4 sm:$0xff]   ;;  %v1916_v37 = vld [vmem:[%s2350_s10 + $0x50] ss:$8 sps:$4 sm:$0xff]   ;;  %v1921_v38 = vld [vmem:[%s2350_s10 + $0x64] ss:$8 sps:$4 sm:$0xff]  }
 0x129   : > { %933 = vmatpush1.bf16.msra.mxu0 %v1823_v45  ;;  %v1919_v39 = vld [vmem:[%s2350_s10 + $0x60] ss:$8 sps:$4 sm:$0xff]   ;;  %v1924_v40 = vld [vmem:[%s2350_s10 + $0x74] ss:$8 sps:$4 sm:$0xff]   ;;  %v1922_v41 = vld [vmem:[%s2350_s10 + $0x70] ss:$8 sps:$4 sm:$0xff]  }
 0x12a   : > { %934 = vmatprep.subr.bf16.mxu0 %v1827_v46  ;;  %v1927_v42 = vld [vmem:[%s2350_s10 + $0x84] ss:$8 sps:$4 sm:$0xff]   ;;  %v1925_v43 = vld [vmem:[%s2350_s10 + $0x80] ss:$8 sps:$4 sm:$0xff]   ;;  %v1930_v44 = vld [vmem:[%s2350_s10 + $0x94] ss:$8 sps:$4 sm:$0xff]  }
 0x12b   : > { %1166 = vmatpush1.bf16.msra.mxu1 %v1862_v55  ;;  %v1928_v45 = vld [vmem:[%s2350_s10 + $0x90] ss:$8 sps:$4 sm:$0xff]   ;;  %v1933_v46 = vld [vmem:[%s2350_s10 + $0xa4] ss:$8 sps:$4 sm:$0xff]   ;;  %v1931_v47 = vld [vmem:[%s2350_s10 + $0xa0] ss:$8 sps:$4 sm:$0xff]  }
 0x12c   : > { %1167 = vmatprep.subr.bf16.mxu1 %v1866_v56  ;;  %v1936_v48 = vld [vmem:[%s2350_s10 + $0xb4] ss:$8 sps:$4 sm:$0xff]   ;;  %v1937_v51 = vld [vmem:[%s2350_s10 + $0xc0] ss:$8 sps:$4 sm:$0xff]   ;;  %v1946_v57 = vld [vmem:[%s2350_s10 + $0xf0] ss:$8 sps:$4 sm:$0xff]  }
 0x12d   : > { %935 = vmatpush1.bf16.msra.mxu0 %v1829_v49  ;;  %v1934_v49 = vld [vmem:[%s2350_s10 + $0xb0] ss:$8 sps:$4 sm:$0xff]   ;;  %v1942_v52 = vld [vmem:[%s2350_s10 + $0xd4] ss:$8 sps:$4 sm:$0xff]   ;;  %v1943_v55 = vld [vmem:[%s2350_s10 + $0xe0] ss:$8 sps:$4 sm:$0xff]  }
 0x12e   : > { %936 = vmatprep.subr.bf16.mxu0 %v1833_v50  ;;  %v1939_v50 = vld [vmem:[%s2350_s10 + $0xc4] ss:$8 sps:$4 sm:$0xff]   ;;  %v1948_v56 = vld [vmem:[%s2350_s10 + $0xf4] ss:$8 sps:$4 sm:$0xff]  }
 0x12f   : > { %1168 = vmatpush1.bf16.msra.mxu1 %v1868_v61 }
 0x130   : > { %1169 = vmatprep.subr.bf16.mxu1 %v1872_v62 }
 0x131   : > { %937 = vmatpush1.bf16.msra.mxu0 %v1835_v53  ;;  %v1940_v53 = vld [vmem:[%s2350_s10 + $0xd0] ss:$8 sps:$4 sm:$0xff]  }
 0x132   : > { %938 = vmatprep.subr.bf16.mxu0 %v1839_v54  ;;  %v1945_v54 = vld [vmem:[%s2350_s10 + $0xe4] ss:$8 sps:$4 sm:$0xff]  }
 0x133   : > { %1170 = vmatpush1.bf16.msra.mxu1 %v1874_v1 }
 0x134   : > { %1171 = vmatprep.subr.bf16.mxu1 %v1878_v2 }
 0x135   : > { %939 = vmatpush1.bf16.msra.mxu0 %v1841_v58 }
 0x136   : > { %940 = vmatprep.subr.bf16.mxu0 %v1845_v60 }
 0x137   : > { %1172 = vmatpush1.bf16.msra.mxu1 %v1880_v5 }
 0x138   : > { %1173 = vmatprep.subr.bf16.mxu1 %v1883_v6 }
 0x139   : > { %941 = vmatpush1.bf16.msra.mxu0 %v1847_v63 }
 0x13a   : > { %942 = vmatprep.subr.bf16.mxu0 %v1851_v0 }
 0x13b   : > { %1174 = vmatpush1.bf16.msra.mxu1 %v1885_v9 }
 0x13c   : > { %1175 = vmatprep.subr.bf16.mxu1 %v1886_v10 }
 0x13d   : > { %943 = vmatpush1.bf16.msra.mxu0 %v1853_v3 }
 0x13e   : > { %944 = vmatprep.subr.bf16.mxu0 %v1857_v4 }
 0x13f   : > { %1176 = vmatpush1.bf16.msra.mxu1 %v1888_v14 }
 0x140   : > { %1177 = vmatprep.subr.bf16.mxu1 %v1889_v15 }
 0x141   : > { %945 = vmatpush1.bf16.msra.mxu0 %v1859_v7 }
 0x142   : > { %946 = vmatprep.subr.bf16.mxu0 %v1863_v8 }
 0x143   : > { %1178 = vmatpush1.bf16.msra.mxu1 %v1891_v17  ;;  %v1211_v17 = vld [vmem:[#allocation2 + $0x8] sm:$0xff] }
 0x144   : > { %1179 = vmatprep.subr.bf16.mxu1 %v1892_v18 }
 0x145   : > { %947 = vmatpush1.bf16.msra.mxu0 %v1865_v11 }
 0x146   : > { %948 = vmatprep.subr.bf16.mxu0 %v1869_v12 }
 0x147   : > { %1180 = vmatpush1.bf16.msra.mxu1 %v1894_v21 }
 0x148   : > { %1181 = vmatprep.subr.bf16.mxu1 %v1895_v23 }
 0x149   : > { %949 = vmatpush1.bf16.msra.mxu0 %v1871_v13 }
 0x14a   : > { %950 = vmatprep.subr.bf16.mxu0 %v1875_v16  ;;  %v1210_v16 = vld [vmem:[#allocation2] sm:$0xff] }
 0x14b   : > { %1182 = vmatpush1.bf16.msra.mxu1 %v1897_v26 }
 0x14c   : > { %1183 = vmatprep.subr.bf16.mxu1 %v1898_v27 }
 0x14d   : > { %951 = vmatpush1.bf16.msra.mxu0 %v1877_v19 }
 0x14e   : > { %1406 = vmatprep.subr.bf16.mxu0 %v1903_v20 }
 0x14f   : > { %1184 = vmatpush1.bf16.msra.mxu1 %v1900_v30 }
 0x150   : > { %953 = vmatmul.mubr.bf16.vlgmr.msra.gmra.mrb[0].mxu0 %v1629_v22 }
 0x151   : > { %1407 = vmatpush1.bf16.msra.mxu0 %v1901_v24  ;;  %v1455_v24 = vld [vmem:[%s2514_s5] sm:$0xff] (!%p1729_p7) }
 0x152   : > { %1408 = vmatprep.subr.bf16.mxu0 %v1906_v25  ;;  %1186 = vmatmul.mubr.bf16.vlgmr.msra.gmra.mrb[0].mxu1 %v1629_v22  ;;  %v1456_v27 = vunpack.c.l.bf16 (!%p1729_p7), %v1455_v24 }
 0x155   : > { %1409 = vmatpush1.bf16.msra.mxu0 %v1904_v28  ;;  %v1457_v28 = vunpack.c.h.bf16 (!%p1729_p7), %v1455_v24 }
 0x156   : > { %1410 = vmatprep.subr.bf16.mxu0 %v1909_v29 }
 0x159   : > { %1411 = vmatpush1.bf16.msra.mxu0 %v1907_v31 }
 0x15a   : > { %1412 = vmatprep.subr.bf16.mxu0 %v1912_v32 }
 0x15d   : > { %1413 = vmatpush1.bf16.msra.mxu0 %v1910_v33 }
 0x15e   : > { %1414 = vmatprep.subr.bf16.mxu0 %v1915_v34 }
 0x161   : > { %1415 = vmatpush1.bf16.msra.mxu0 %v1913_v35 }
 0x162   : > { %1416 = vmatprep.subr.bf16.mxu0 %v1918_v36 }
 0x165   : > { %1417 = vmatpush1.bf16.msra.mxu0 %v1916_v37 }
 0x166   : > { %1418 = vmatprep.subr.bf16.mxu0 %v1921_v38 }
 0x169   : > { %1419 = vmatpush1.bf16.msra.mxu0 %v1919_v39 }
 0x16a   : > { %1420 = vmatprep.subr.bf16.mxu0 %v1924_v40 }
 0x16d   : > { %1421 = vmatpush1.bf16.msra.mxu0 %v1922_v41 }
 0x16e   : > { %1422 = vmatprep.subr.bf16.mxu0 %v1927_v42 }
 0x171   : > { %1423 = vmatpush1.bf16.msra.mxu0 %v1925_v43 }
 0x172   : > { %1424 = vmatprep.subr.bf16.mxu0 %v1930_v44 }
 0x175   : > { %1425 = vmatpush1.bf16.msra.mxu0 %v1928_v45 }
 0x176   : > { %1426 = vmatprep.subr.bf16.mxu0 %v1933_v46 }
 0x179   : > { %1427 = vmatpush1.bf16.msra.mxu0 %v1931_v47 }
 0x17a   : > { %1428 = vmatprep.subr.bf16.mxu0 %v1936_v48 }
 0x17d   : > { %1429 = vmatpush1.bf16.msra.mxu0 %v1934_v49 }
 0x17e   : > { %1430 = vmatprep.subr.bf16.mxu0 %v1939_v50 }
 0x181   : > { %1431 = vmatpush1.bf16.msra.mxu0 %v1937_v51 }
 0x182   : > { %1432 = vmatprep.subr.bf16.mxu0 %v1942_v52 }
 0x185   : > { %1433 = vmatpush1.bf16.msra.mxu0 %v1940_v53 }
 0x186   : > { %1434 = vmatprep.subr.bf16.mxu0 %v1945_v54 }
 0x189   : > { %1435 = vmatpush1.bf16.msra.mxu0 %v1943_v55 }
 0x18a   : > { %1436 = vmatprep.subr.bf16.mxu0 %v1948_v56 }
 0x18d   : > { %1437 = vmatpush1.bf16.msra.mxu0 %v1946_v57 }
 0x223   : > { %v954_v58 = vpop.f32.mrb[0].mxu0 }
 0x224   : > { %v1695_v59 = vmul.f32 -1.442695, %v954_v58  ;;  %v956_v60 = vpop.f32.mrb[1].mxu0 }
 0x225   : > { %v1696_v61 = vmul.f32 -1.442695, %v956_v60  ;;  %v958_v62 = vpop.f32.mrb[2].mxu0  ;;  %v1187_v0 = vpop.f32.mrb[0].mxu1 }
 0x226   : > { %1949 = vpow2.f32 %v1695_v59  ;;  %v959_v63 = vpop.f32.mrb[3].mxu0  ;;  %v1189_v1 = vpop.f32.mrb[1].mxu1 }
 0x227   : > { %1951 = vpow2.f32 %v1696_v61  ;;  %v1191_v2 = vpop.f32.mrb[2].mxu1 }
 0x228   : > { %v1192_v4 = vpop.f32.mrb[3].mxu1 }
 0x230   : > { %v1950_v3 = vpop.eup %1949 }
 0x231   : > { %v1952_v5 = vpop.eup %1951  ;;  %v1200_v6 = vadd.f32 1.0, %v1950_v3 }
 0x232   : > { %v1201_v7 = vadd.f32 1.0, %v1952_v5 }
 0x233   : > { %1953 = vrcp.f32 %v1200_v6 }
 0x234   : > { %1955 = vrcp.f32 %v1201_v7 }
 0x23d   : > { %v1954_v8 = vpop.eup %1953 }
 0x23e   : > { %v1956_v9 = vpop.eup %1955  ;;  %v1206_v10 = vmul.f32 %v1954_v8, %v954_v58 }
 0x23f   : > { %v1207_v11 = vmul.f32 %v1956_v9, %v956_v60 }
 0x240   : > { %v1208_v12 = vmul.f32 %v1206_v10, %v1187_v0 }
 0x241   : > { %v1209_v13 = vmul.f32 %v1207_v11, %v1189_v1 }
 0x242   : > { %v1212_v15 = vpack.c.bf16 %v1208_v12, %v1208_v12 }
 0x243   : > { %v1213_v14 = vpack.c.bf16 %v1209_v13, %v1209_v13 }
 0x245   : > { %1438 = vmatprep.mubr.bf16.mxu0 %v1213_v14 }
 0x246   : > { %1439 = vmatmul.mubr.bf16.vlgmr.msra.gmra.mrb[4].mxu0 %v1212_v15 }
 0x317   : > { %1454 = sbr.rel (%p1729_p7) target bundleno = 810 (0x32a), region = 132 }
 0x319   : > { %v1440_v18 = vpop.f32.mrb[4].mxu0 }
 0x31a   : > { %v1447_v19 = vadd.f32 %v1440_v18, %v1210_v16  ;;  %v1442_v20 = vpop.f32.mrb[5].mxu0 }
 0x31b   : > { %v1448_v21 = vadd.f32 %v1442_v20, %v1211_v17  ;;  %v1444_v22 = vpop.f32.mrb[6].mxu0 }
 0x31c   : > { %1449 = vst [vmem:[#allocation2] sm:$0xff] %v1447_v19  ;;  %v1445_v23 = vpop.f32.mrb[7].mxu0 }
 0x31d   : > { %1450 = vst [vmem:[#allocation2 + $0x8] sm:$0xff] %v1448_v21 }
 0x323   : > { %v1458_v25 = vld [vmem:[#allocation2] sm:$0xff] }
 0x324   : > { %v1459_v26 = vld [vmem:[#allocation2 + $0x8] sm:$0xff]  ;;  %v1460_v29 = vadd.f32 %v1458_v25, %v1456_v27 }
 0x325   : > { %v1461_v30 = vadd.f32 %v1459_v26, %v1457_v28 }
 0x327   : > { %v1740_v31 = vpack.c.bf16 %v1461_v30, %v1460_v29 }
 0x329   : > { %1470 = vst [vmem:[#allocation9] sm:$0xff] %v1740_v31 }
 0x32a PF: > { %p2465_p2 = scmp.eq.s32.totalorder %s1608_s27, 1  ;;  %s2071_s24 = smov [#allocation9]  }
 0x32b   : > { %s1481_s14 = sshll.u32 %s2071_s24, 4  ;;  %s1482_s14 = int_to_ptr.vmem [resolvable:$true] %s1481_s14 }
 0x32c   : > { %s1985_s16 = scalar_lea.vmem %s1482_s14, 128  ;;  %p1992_p8 = scmp.lt.s32.totalorder %s1482_s14, %s1482_s14 }
 0x32d   : > { %p1986_p4 = scmp.ne.s32.totalorder %s1482_s14, %s1985_s16  ;;  %p1993_p9 = scmp.lt.s32.totalorder %s1985_s16, %s1985_s16 }
 0x32f   : > { %p1987_p5 = pnand %p1986_p4, %p2465_p2  ;;  %p1994_p10 = por %p1993_p9, %p1992_p8 }
 0x331   : > { %p1988_p6 = pneg %p1987_p5 }
 0x333   : > { %p1995_p12 = pnand %p1994_p10, %p1988_p6 }
 0x335   : > { %1998 = shalt.err (!%p1995_p12)
}
 0x336   : > { %s1999_s27 = scalar_lea.hbm %s2515_s6, 128 }
 0x337   : > { %p2000_p13 = scmp.ne.s32.totalorder %s2515_s6, %s1999_s27  ;;  %p2005_p1 = scmp.lt.u32.totalorder %s1999_s27, %s2515_s6 }
 0x339   : > { %p2001_p11 = pnand %p2000_p13, %p2465_p2 }
 0x33b   : > { %p2002_p0 = pneg %p2001_p11 }
 0x33d   : > { %p2007_p3 = pnand %p2005_p1, %p2002_p0 }
 0x33f   : > { %2010 = shalt.err (!%p2007_p3)
}
 0x340   : > { %1744 = dma.vmem_to_hbm [thread:$0]  (%p2465_p2), %s1482_s14, 128, %s2515_s6, [#allocation8]  }
 0x341   : > { %2040 = dma.done.wait (%p2465_p2), [#allocation8], 128  }
 0x342   : > { %2042 = vsyncadd (%p2465_p2), [#allocation8], 4294967168 }
 0x343 PF: > { %s20_s26 = sadd.s32 1, %s2065_s26   ;;  %s2519_s21 = smov %s2049_s22 }
 0x344   : > { %p17_p7 = scmp.ge.s32.totalorder %s20_s26, 4   ;;  %s2520_s22 = smov %s2053_s23 }
 0x345   : > { %s2521_s23 = smov %s2157_s9  ;;  %s2522_s24 = smov %s2061_s25 }
 0x346   : > { %s2523_s25 = smov %s2525_s28  ;;  %19 = sbr.rel (!%p17_p7) target bundleno = 5 (0x5), region = 188 }
 0x34d   :  { %1494 = vsyncpa [#allocation7], 1 }
 0x34e   :  { %1496 = vsyncpa [#allocation7 + $0x1], 1 }
 0x34f   :  { %1497 = vsyncpa [#allocation8], 1 }
 0x350   :  { %1499 = vsyncpa [#allocation8 + $0x1], 1 }

</bundles_post_ra>
